<compile_context>
chip_gen: v7x
topology: tpu7x:2x2x1
jax: 0.10.0
libtpu: 0.0.40
codegen_flags: <defaults>
</compile_context>

<pallas_src>
import functools
import math

import jax
import jax.numpy as jnp
from jax import lax
from jax.experimental import pallas as pl
from jax.experimental.pallas import tpu as pltpu


# ---------------------------------------------------------------------------
# Tiling helpers
# ---------------------------------------------------------------------------
def _row_tile(m, cap=256):
    """Largest multiple of 8 that divides m (<= cap); falls back to full m."""
    if m % 8 != 0:
        return m
    best, d = 8, 8
    while d <= min(m, cap):
        if m % d == 0:
            best = d
        d += 8
    return best


def _lane_tile(n, cap=512):
    """Largest multiple of 128 that divides n (<= cap); falls back to full n."""
    if n % 128 != 0:
        return n
    best, d = 128, 128
    while d <= min(n, cap):
        if n % d == 0:
            best = d
        d += 128
    return best


# ---------------------------------------------------------------------------
# BitLinear kernels
# ---------------------------------------------------------------------------
def _quant_prologue(x, in_features):
    """SimpleRMSNorm (x / RMS(x)) followed by per-token 8-bit fake quant.

    Returns integer-valued activations (exact in bf16) and the per-row
    clamp(max|x_norm|, 1e-5) needed for the output descale.
    """
    ss = jnp.sum(x * x, axis=-1, keepdims=True)
    # F.normalize eps=1e-12: 1/max(||x||,1e-12) == rsqrt(max(ss, 1e-24))
    inv_rms = lax.rsqrt(jnp.maximum(ss, 1e-24)) * (in_features ** 0.5)
    max_xn = jnp.maximum(
        inv_rms * jnp.max(jnp.abs(x), axis=-1, keepdims=True), 1e-5)
    x_int = jnp.clip(jnp.round(x * (inv_rms * (127.0 / max_xn))),
                     -128.0, 127.0)
    return x_int, max_xn


def _bitlinear_kernel(x_ref, wt_ref, ws_ref, o_ref, xq_ref, ds_ref,
                      *, in_features):
    """BitLinear: RMSNorm -> activation_quant (cached over N tiles) -> MXU."""
    @pl.when(pl.program_id(1) == 0)
    def _():
        x = x_ref[...].astype(jnp.float32)
        x_int, max_xn = _quant_prologue(x, in_features)
        xq_ref[...] = x_int.astype(jnp.bfloat16)
        # descale = max|x_norm| * mean|w| / 127   (no divides)
        ds_ref[...] = max_xn * (ws_ref[0] * (1.0 / 127.0))
    acc = jnp.dot(xq_ref[...], wt_ref[...].astype(jnp.bfloat16),
                  preferred_element_type=jnp.float32)
    o_ref[...] = (acc * ds_ref[...]).astype(o_ref.dtype)


def _bitlinear_ln_kernel(x_ref, g_ref, b_ref, wt_ref, ws_ref, o_ref,
                         xq_ref, ds_ref, *, in_features, eps):
    """LayerNorm fused into the BitLinear prologue (out_proj path)."""
    @pl.when(pl.program_id(1) == 0)
    def _():
        x = x_ref[...].astype(jnp.float32)
        mu = jnp.mean(x, axis=-1, keepdims=True)
        xc = x - mu
        var = jnp.mean(xc * xc, axis=-1, keepdims=True)
        x = xc * lax.rsqrt(var + eps) * g_ref[...] + b_ref[...]
        x_int, max_xn = _quant_prologue(x, in_features)
        xq_ref[...] = x_int.astype(jnp.bfloat16)
        ds_ref[...] = max_xn * (ws_ref[0] * (1.0 / 127.0))
    acc = jnp.dot(xq_ref[...], wt_ref[...].astype(jnp.bfloat16),
                  preferred_element_type=jnp.float32)
    o_ref[...] = (acc * ds_ref[...]).astype(o_ref.dtype)


# ---------------------------------------------------------------------------
# GQA attention kernel (one batch element x one query-row tile per step)
# ---------------------------------------------------------------------------
def _gqa_attn_kernel(q_ref, k_ref, v_ref, o_ref,
                     *, kv_heads, num_groups, head_dim, inv_scale):
    """Group-sum queries -> per-head QK^T -> softmax -> PV, packed output.

    inv_scale = 1/head_dim folds the reference's double scaling
    (query/sqrt(d) then similarity/sqrt(d)) into one multiply.
    """
    q_all = q_ref[0].astype(jnp.float32)      # (tq, Hq*d)
    k_all = k_ref[0]                          # (s,  Hk*d) bf16
    v_all = v_ref[0]                          # (s,  Hk*d) bf16
    outs = []
    for h in range(kv_heads):
        base = h * num_groups * head_dim
        qg = q_all[:, base:base + head_dim]
        for g in range(1, num_groups):
            off = base + g * head_dim
            qg = qg + q_all[:, off:off + head_dim]
        k_h = k_all[:, h * head_dim:(h + 1) * head_dim]
        v_h = v_all[:, h * head_dim:(h + 1) * head_dim]
        sim = lax.dot_general(qg.astype(jnp.bfloat16), k_h,
                              (((1,), (1,)), ((), ())),
                              preferred_element_type=jnp.float32) * inv_scale
        m = jnp.max(sim, axis=-1, keepdims=True)
        p = jnp.exp(sim - m)
        l = jnp.sum(p, axis=-1, keepdims=True)
        attn = p * pl.reciprocal(l, approx=True)
        outs.append(jnp.dot(attn.astype(jnp.bfloat16), v_h,
                            preferred_element_type=jnp.float32))
    o_ref[0] = jnp.concatenate(outs, axis=-1).astype(o_ref.dtype)


# ---------------------------------------------------------------------------
# Wrappers
# ---------------------------------------------------------------------------
def prepare_bitlinear_weight(w):
    """weight_quant hoisted out of the per-call path: ternary sign(w - mean(w))
    stored pre-transposed as int8 (+ scalar mean|w| scale)."""
    w = w.astype(jnp.float32)
    scale = jnp.mean(jnp.abs(w)).reshape(1)                    # mean |w|
    sign_t = jnp.sign(w - jnp.mean(w)).T.astype(jnp.int8)      # (K, N) in {-1,0,1}
    return {'wt': sign_t, 'scale': scale}


def bitlinear(x, wq, *, ln_params=None, ln_eps=1e-5, out_dtype=jnp.float32):
    """BitLinear.forward (optionally with a fused preceding LayerNorm).

    NOTE: BitLinear.forward never adds self.bias (F.linear without bias), so no
    bias is applied even though the module creates one (zero-initialized).
    """
    orig = x.shape
    K = orig[-1]
    wt, ws = wq['wt'], wq['scale']
    N = wt.shape[1]
    x2 = x.reshape(-1, K)
    M = x2.shape[0]
    tm = _row_tile(M, cap=256)
    tn = _lane_tile(N, cap=512)
    out_isize = 2 if out_dtype == jnp.bfloat16 else 4
    cost = pl.CostEstimate(
        flops=2 * M * K * N,
        transcendentals=0,
        bytes_accessed=(x2.dtype.itemsize * M * K
                        + (M // tm) * K * N            # int8 weight re-stream
                        + out_isize * M * N))

    x_spec = pl.BlockSpec((tm, K), lambda i, j: (i, 0))
    w_spec = pl.BlockSpec((K, tn), lambda i, j: (0, j))
    s_spec = pl.BlockSpec(memory_space=pltpu.MemorySpace.SMEM)
    out_spec = pl.BlockSpec((tm, tn), lambda i, j: (i, j))
    scratch = [pltpu.VMEM((tm, K), jnp.bfloat16),      # cached quantized acts
               pltpu.VMEM((tm, 1), jnp.float32)]       # cached per-row descale

    if ln_params is None:
        kern = functools.partial(_bitlinear_kernel, in_features=K)
        in_specs = [x_spec, w_spec, s_spec]
        args = (x2, wt, ws)
    else:
        g, b = ln_params
        kern = functools.partial(_bitlinear_ln_kernel, in_features=K, eps=ln_eps)
        gb_spec = pl.BlockSpec((1, K), lambda i, j: (0, 0))
        in_specs = [x_spec, gb_spec, gb_spec, w_spec, s_spec]
        args = (x2, g.reshape(1, K), b.reshape(1, K), wt, ws)

    out = pl.pallas_call(
        kern,
        out_shape=jax.ShapeDtypeStruct((M, N), out_dtype),
        grid=(M // tm, N // tn),
        in_specs=in_specs,
        out_specs=out_spec,
        scratch_shapes=scratch,
        compiler_params=pltpu.CompilerParams(
            # j (N tiles) is innermost + arbitrary: the quant scratch computed
            # at j==0 is reused across it; row tiles are independent.
            dimension_semantics=("parallel", "arbitrary"),
            vmem_limit_bytes=32 * 1024 * 1024),
        cost_estimate=cost,
    )(*args)
    return out.reshape(*orig[:-1], N)


def gqa_attention(q, k, v, *, query_heads, kv_heads, out_dtype=jnp.bfloat16):
    """q: (B, n, Hq*d) ; k, v: (B, s, Hk*d) — packed, un-transposed layouts."""
    B, n, E = q.shape
    s, kvE = k.shape[1], k.shape[2]
    d = E // query_heads
    tq = _row_tile(n, cap=512)
    out_isize = 2 if out_dtype == jnp.bfloat16 else 4
    cost = pl.CostEstimate(
        flops=4 * B * kv_heads * n * s * d,
        transcendentals=B * kv_heads * n * s,
        bytes_accessed=(q.dtype.itemsize * B * n * E
                        + 2 * k.dtype.itemsize * B * s * kvE
                        + out_isize * B * n * kvE))
    return pl.pallas_call(
        functools.partial(_gqa_attn_kernel,
                          kv_heads=kv_heads,
                          num_groups=query_heads // kv_heads,
                          head_dim=d,
                          inv_scale=1.0 / d),
        out_shape=jax.ShapeDtypeStruct((B, n, kvE), out_dtype),
        grid=(B, n // tq),
        in_specs=[pl.BlockSpec((1, tq, E), lambda b, i: (b, i, 0)),
                  pl.BlockSpec((1, s, kvE), lambda b, i: (b, 0, 0)),
                  pl.BlockSpec((1, s, kvE), lambda b, i: (b, 0, 0))],
        out_specs=pl.BlockSpec((1, tq, kvE), lambda b, i: (b, i, 0)),
        compiler_params=pltpu.CompilerParams(
            dimension_semantics=("parallel", "parallel"),
            vmem_limit_bytes=32 * 1024 * 1024),
        cost_estimate=cost,
    )(q, k, v)


# ---------------------------------------------------------------------------
# BitMGQA forward (default call flags: need_weights=False, is_causal=False,
# average_attn_weights=False; dropout is never applied by the reference forward)
# ---------------------------------------------------------------------------
def bit_mgqa_forward(query, key, value, params, *, query_heads, kv_heads):
    # q/k/v projections emit bf16: their only consumer is the bf16 attention MXU.
    q = bitlinear(query, params['q_proj'], out_dtype=jnp.bfloat16)   # (B, n, E)
    k = bitlinear(key, params['k_proj'], out_dtype=jnp.bfloat16)     # (B, s, kvE)
    v = bitlinear(value, params['v_proj'], out_dtype=jnp.bfloat16)   # (B, s, kvE)

    # Attention works directly on the packed projection layouts: the query
    # group-sum, per-head attention and the 'b h n d -> b n (h d)' packing all
    # happen inside the kernel (no XLA transposes).
    x = gqa_attention(q, k, v, query_heads=query_heads, kv_heads=kv_heads,
                      out_dtype=jnp.bfloat16)                        # (B, n, kvE)

    # LayerNorm fused into the out_proj BitLinear prologue.
    x = bitlinear(x, params['out_proj'],
                  ln_params=(params['ln_g'], params['ln_b']), ln_eps=1e-5,
                  out_dtype=jnp.float32)                             # (B, n, E)
    # TODO(synk): need_weights / is_causal masking / dropout are not exercised
    # by the default forward call and are not implemented here.
    return x, None


# ---------------------------------------------------------------------------
# Deterministic parameter init (xavier_normal_ as in _reset_parameters)
# ---------------------------------------------------------------------------
def init_params(key, embed_dim, query_heads, kv_heads, gamma_init=1.0):
    head_dim = embed_dim // query_heads
    kv_embed_dim = head_dim * kv_heads

    def xavier_normal(k, fan_out, fan_in, gain=1.0):
        std = gain * math.sqrt(2.0 / (fan_in + fan_out))
        return std * jax.random.normal(k, (fan_out, fan_in), jnp.float32)

    k1, k2, k3, k4 = jax.random.split(key, 4)
    # All BitLinear biases are zero-initialized and never added by forward.
    return {
        'q_proj': prepare_bitlinear_weight(xavier_normal(k1, embed_dim, embed_dim)),
        'k_proj': prepare_bitlinear_weight(xavier_normal(k2, kv_embed_dim, embed_dim)),
        'v_proj': prepare_bitlinear_weight(
            xavier_normal(k3, kv_embed_dim, embed_dim, gain=gamma_init)),
        'out_proj': prepare_bitlinear_weight(
            xavier_normal(k4, embed_dim, kv_embed_dim, gain=gamma_init)),
        'ln_g': jnp.ones((kv_embed_dim,), jnp.float32),
        'ln_b': jnp.zeros((kv_embed_dim,), jnp.float32),
    }


# ---------------------------------------------------------------------------
if __name__ == "__main__":
    embed_dim, query_heads, kv_heads = 64, 8, 4      # head_dim=8, kv_embed_dim=32
    B, n, s = 2, 8, 8

    root = jax.random.PRNGKey(0)
    pkey, qk, kk, vk = jax.random.split(root, 4)
    params = init_params(pkey, embed_dim, query_heads, kv_heads)
    query = jax.random.normal(qk, (B, n, embed_dim), jnp.float32)
    key_in = jax.random.normal(kk, (B, s, embed_dim), jnp.float32)
    value = jax.random.normal(vk, (B, s, embed_dim), jnp.float32)

    fwd = jax.jit(functools.partial(
        bit_mgqa_forward, query_heads=query_heads, kv_heads=kv_heads))
    out, attn_w = fwd(query, key_in, value, params)
    out = jax.block_until_ready(out)
    assert out.shape == (B, n, embed_dim) and out.dtype == jnp.float32
    assert attn_w is None
    print("KERNEL_OK")
</pallas_src>

<mosaic_0001>
module attributes {stable_mosaic.version = 11 : i64} {
  func.func @_bitlinear_kernel(%arg0: i32, %arg1: i32, %arg2: memref<16x64xf32, #tpu.memory_space<vmem>>, %arg3: memref<64x32xi8, #tpu.memory_space<vmem>>, %arg4: memref<1xf32, #tpu.memory_space<smem>>, %arg5: memref<16x32xbf16, #tpu.memory_space<vmem>>, %arg6: memref<16x64xbf16, #tpu.memory_space<vmem>>, %arg7: memref<16x1xf32, #tpu.memory_space<vmem>>) attributes {dimension_semantics = [#tpu.dimension_semantics<parallel>, #tpu.dimension_semantics<arbitrary>], iteration_bounds = array<i64: 1, 1>, scalar_prefetch = 0 : i64, scratch_operands = 2 : i64, tpu.core_type = #tpu.core_type<tc>, window_params = [{transform_indices = @transform_0, window_bounds = array<i64: 16, 64>}, {transform_indices = @transform_1, window_bounds = array<i64: 64, 32>}, {transform_indices = @transform_2, window_bounds = array<i64: 1>}, {transform_indices = @transform_3, window_bounds = array<i64: 16, 32>}]} {
    %c0_i32 = arith.constant 0 : i32
    %0 = arith.cmpi eq, %arg1, %c0_i32 : i32
    %1 = arith.extui %0 : i1 to i32
    %c0_i32_0 = arith.constant 0 : i32
    %2 = arith.cmpi ne, %1, %c0_i32_0 : i32
    scf.if %2 {
      %c0_8 = arith.constant 0 : index
      %c0_9 = arith.constant 0 : index
      %12 = vector.load %arg2[%c0_8, %c0_9] : memref<16x64xf32, #tpu.memory_space<vmem>>, vector<16x64xf32>
      %13 = arith.mulf %12, %12 : vector<16x64xf32>
      %cst_10 = arith.constant dense<0.000000e+00> : vector<16xf32>
      %14 = vector.multi_reduction <add>, %13, %cst_10 [1] : vector<16x64xf32> to vector<16xf32>
      %15 = vector.shape_cast %14 : vector<16xf32> to vector<16x1xf32>
      %cst_11 = arith.constant 1.000000e-24 : f32
      %16 = vector.broadcast %cst_11 : f32 to vector<16x1xf32>
      %17 = arith.maximumf %15, %16 : vector<16x1xf32>
      %18 = math.rsqrt %17 : vector<16x1xf32>
      %cst_12 = arith.constant 8.000000e+00 : f32
      %19 = vector.broadcast %cst_12 : f32 to vector<16x1xf32>
      %20 = arith.mulf %18, %19 : vector<16x1xf32>
      %21 = math.absf %12 : vector<16x64xf32>
      %cst_13 = arith.constant dense<0xFF800000> : vector<16xf32>
      %22 = vector.multi_reduction <maximumf>, %21, %cst_13 [1] : vector<16x64xf32> to vector<16xf32>
      %23 = vector.shape_cast %22 : vector<16xf32> to vector<16x1xf32>
      %24 = arith.mulf %20, %23 : vector<16x1xf32>
      %cst_14 = arith.constant 9.99999974E-6 : f32
      %25 = vector.broadcast %cst_14 : f32 to vector<16x1xf32>
      %26 = arith.maximumf %24, %25 : vector<16x1xf32>
      %cst_15 = arith.constant 1.270000e+02 : f32
      %27 = vector.broadcast %cst_15 : f32 to vector<16x1xf32>
      %28 = arith.divf %27, %26 : vector<16x1xf32>
      %29 = arith.mulf %20, %28 : vector<16x1xf32>
      %30 = vector.broadcast %29 : vector<16x1xf32> to vector<16x64xf32>
      %31 = arith.mulf %12, %30 : vector<16x64xf32>
      %32 = math.roundeven %31 : vector<16x64xf32>
      %cst_16 = arith.constant -1.280000e+02 : f32
      %cst_17 = arith.constant 1.270000e+02 : f32
      %33 = vector.broadcast %cst_16 : f32 to vector<16x64xf32>
      %34 = arith.maximumf %33, %32 : vector<16x64xf32>
      %35 = vector.broadcast %cst_17 : f32 to vector<16x64xf32>
      %36 = arith.minimumf %35, %34 : vector<16x64xf32>
      %37 = arith.truncf %36 : vector<16x64xf32> to vector<16x64xbf16>
      %c0_18 = arith.constant 0 : index
      %c0_19 = arith.constant 0 : index
      %38 = vector.load %arg6[%c0_18, %c0_19] : memref<16x64xbf16, #tpu.memory_space<vmem>>, vector<16x64xbf16>
      tpu.vector_store %arg6[%c0_18, %c0_19], %37 {strides = array<i32>} : memref<16x64xbf16, #tpu.memory_space<vmem>>, vector<16x64xbf16>,
      %c0_20 = arith.constant 0 : index
      %39 = memref.load %arg4[%c0_20] : memref<1xf32, #tpu.memory_space<smem>>
      %cst_21 = arith.constant 0.00787401571 : f32
      %40 = arith.mulf %39, %cst_21 : f32
      %41 = vector.broadcast %40 : f32 to vector<16x1xf32>
      %42 = arith.mulf %26, %41 : vector<16x1xf32>
      %c0_22 = arith.constant 0 : index
      %c0_23 = arith.constant 0 : index
      %43 = vector.load %arg7[%c0_22, %c0_23] : memref<16x1xf32, #tpu.memory_space<vmem>>, vector<16x1xf32>
      tpu.vector_store %arg7[%c0_22, %c0_23], %42 {strides = array<i32>} : memref<16x1xf32, #tpu.memory_space<vmem>>, vector<16x1xf32>,
    } else {
    }
    %c0 = arith.constant 0 : index
    %c0_1 = arith.constant 0 : index
    %3 = vector.load %arg6[%c0, %c0_1] : memref<16x64xbf16, #tpu.memory_space<vmem>>, vector<16x64xbf16>
    %c0_2 = arith.constant 0 : index
    %c0_3 = arith.constant 0 : index
    %4 = vector.load %arg3[%c0_2, %c0_3] : memref<64x32xi8, #tpu.memory_space<vmem>>, vector<64x32xi8>
    %5 = arith.sitofp %4 : vector<64x32xi8> to vector<64x32xbf16>
    %cst = arith.constant dense<0.000000e+00> : vector<16x32xf32>
    %6 = tpu.matmul %3, %5, %cst {dimension_numbers = #tpu.dot_dimension_numbers<[1], [0], [0], [1], [0, 0, 1, 1], [], []>} : vector<16x64xbf16>, vector<64x32xbf16>, vector<16x32xf32> -> vector<16x32xf32>
    %c0_4 = arith.constant 0 : index
    %c0_5 = arith.constant 0 : index
    %7 = vector.load %arg7[%c0_4, %c0_5] : memref<16x1xf32, #tpu.memory_space<vmem>>, vector<16x1xf32>
    %8 = vector.broadcast %7 : vector<16x1xf32> to vector<16x32xf32>
    %9 = arith.mulf %6, %8 : vector<16x32xf32>
    %10 = arith.truncf %9 : vector<16x32xf32> to vector<16x32xbf16>
    %c0_6 = arith.constant 0 : index
    %c0_7 = arith.constant 0 : index
    %11 = vector.load %arg5[%c0_6, %c0_7] : memref<16x32xbf16, #tpu.memory_space<vmem>>, vector<16x32xbf16>
    tpu.vector_store %arg5[%c0_6, %c0_7], %10 {strides = array<i32>} : memref<16x32xbf16, #tpu.memory_space<vmem>>, vector<16x32xbf16>,
    return
  }
  func.func @transform_0(%arg0: i32, %arg1: i32) -> (i32, i32) {
    %c0_i32 = arith.constant 0 : i32
    %c0_i32_0 = arith.constant 0 : i32
    return %arg0, %c0_i32 : i32, i32
  }
  func.func @transform_1(%arg0: i32, %arg1: i32) -> (i32, i32) {
    %c0_i32 = arith.constant 0 : i32
    %c0_i32_0 = arith.constant 0 : i32
    return %c0_i32, %arg1 : i32, i32
  }
  func.func @transform_2(%arg0: i32, %arg1: i32) -> i32 {
    %c0_i32 = arith.constant 0 : i32
    %c0_i32_0 = arith.constant 0 : i32
    return %c0_i32 : i32
  }
  func.func @transform_3(%arg0: i32, %arg1: i32) -> (i32, i32) {
    %c0_i32 = arith.constant 0 : i32
    return %arg0, %arg1 : i32, i32
  }
}

module attributes {stable_mosaic.version = 11 : i64} {
  func.func @_bitlinear_kernel(%arg0: i32, %arg1: i32, %arg2: memref<16x64xf32, #tpu.memory_space<vmem>>, %arg3: memref<64x64xi8, #tpu.memory_space<vmem>>, %arg4: memref<1xf32, #tpu.memory_space<smem>>, %arg5: memref<16x64xbf16, #tpu.memory_space<vmem>>, %arg6: memref<16x64xbf16, #tpu.memory_space<vmem>>, %arg7: memref<16x1xf32, #tpu.memory_space<vmem>>) attributes {dimension_semantics = [#tpu.dimension_semantics<parallel>, #tpu.dimension_semantics<arbitrary>], iteration_bounds = array<i64: 1, 1>, scalar_prefetch = 0 : i64, scratch_operands = 2 : i64, tpu.core_type = #tpu.core_type<tc>, window_params = [{transform_indices = @transform_0, window_bounds = array<i64: 16, 64>}, {transform_indices = @transform_1, window_bounds = array<i64: 64, 64>}, {transform_indices = @transform_2, window_bounds = array<i64: 1>}, {transform_indices = @transform_3, window_bounds = array<i64: 16, 64>}]} {
    %c0_i32 = arith.constant 0 : i32
    %0 = arith.cmpi eq, %arg1, %c0_i32 : i32
    %1 = arith.extui %0 : i1 to i32
    %c0_i32_0 = arith.constant 0 : i32
    %2 = arith.cmpi ne, %1, %c0_i32_0 : i32
    scf.if %2 {
      %c0_8 = arith.constant 0 : index
      %c0_9 = arith.constant 0 : index
      %12 = vector.load %arg2[%c0_8, %c0_9] : memref<16x64xf32, #tpu.memory_space<vmem>>, vector<16x64xf32>
      %13 = arith.mulf %12, %12 : vector<16x64xf32>
      %cst_10 = arith.constant dense<0.000000e+00> : vector<16xf32>
      %14 = vector.multi_reduction <add>, %13, %cst_10 [1] : vector<16x64xf32> to vector<16xf32>
      %15 = vector.shape_cast %14 : vector<16xf32> to vector<16x1xf32>
      %cst_11 = arith.constant 1.000000e-24 : f32
      %16 = vector.broadcast %cst_11 : f32 to vector<16x1xf32>
      %17 = arith.maximumf %15, %16 : vector<16x1xf32>
      %18 = math.rsqrt %17 : vector<16x1xf32>
      %cst_12 = arith.constant 8.000000e+00 : f32
      %19 = vector.broadcast %cst_12 : f32 to vector<16x1xf32>
      %20 = arith.mulf %18, %19 : vector<16x1xf32>
      %21 = math.absf %12 : vector<16x64xf32>
      %cst_13 = arith.constant dense<0xFF800000> : vector<16xf32>
      %22 = vector.multi_reduction <maximumf>, %21, %cst_13 [1] : vector<16x64xf32> to vector<16xf32>
      %23 = vector.shape_cast %22 : vector<16xf32> to vector<16x1xf32>
      %24 = arith.mulf %20, %23 : vector<16x1xf32>
      %cst_14 = arith.constant 9.99999974E-6 : f32
      %25 = vector.broadcast %cst_14 : f32 to vector<16x1xf32>
      %26 = arith.maximumf %24, %25 : vector<16x1xf32>
      %cst_15 = arith.constant 1.270000e+02 : f32
      %27 = vector.broadcast %cst_15 : f32 to vector<16x1xf32>
      %28 = arith.divf %27, %26 : vector<16x1xf32>
      %29 = arith.mulf %20, %28 : vector<16x1xf32>
      %30 = vector.broadcast %29 : vector<16x1xf32> to vector<16x64xf32>
      %31 = arith.mulf %12, %30 : vector<16x64xf32>
      %32 = math.roundeven %31 : vector<16x64xf32>
      %cst_16 = arith.constant -1.280000e+02 : f32
      %cst_17 = arith.constant 1.270000e+02 : f32
      %33 = vector.broadcast %cst_16 : f32 to vector<16x64xf32>
      %34 = arith.maximumf %33, %32 : vector<16x64xf32>
      %35 = vector.broadcast %cst_17 : f32 to vector<16x64xf32>
      %36 = arith.minimumf %35, %34 : vector<16x64xf32>
      %37 = arith.truncf %36 : vector<16x64xf32> to vector<16x64xbf16>
      %c0_18 = arith.constant 0 : index
      %c0_19 = arith.constant 0 : index
      %38 = vector.load %arg6[%c0_18, %c0_19] : memref<16x64xbf16, #tpu.memory_space<vmem>>, vector<16x64xbf16>
      tpu.vector_store %arg6[%c0_18, %c0_19], %37 {strides = array<i32>} : memref<16x64xbf16, #tpu.memory_space<vmem>>, vector<16x64xbf16>,
      %c0_20 = arith.constant 0 : index
      %39 = memref.load %arg4[%c0_20] : memref<1xf32, #tpu.memory_space<smem>>
      %cst_21 = arith.constant 0.00787401571 : f32
      %40 = arith.mulf %39, %cst_21 : f32
      %41 = vector.broadcast %40 : f32 to vector<16x1xf32>
      %42 = arith.mulf %26, %41 : vector<16x1xf32>
      %c0_22 = arith.constant 0 : index
      %c0_23 = arith.constant 0 : index
      %43 = vector.load %arg7[%c0_22, %c0_23] : memref<16x1xf32, #tpu.memory_space<vmem>>, vector<16x1xf32>
      tpu.vector_store %arg7[%c0_22, %c0_23], %42 {strides = array<i32>} : memref<16x1xf32, #tpu.memory_space<vmem>>, vector<16x1xf32>,
    } else {
    }
    %c0 = arith.constant 0 : index
    %c0_1 = arith.constant 0 : index
    %3 = vector.load %arg6[%c0, %c0_1] : memref<16x64xbf16, #tpu.memory_space<vmem>>, vector<16x64xbf16>
    %c0_2 = arith.constant 0 : index
    %c0_3 = arith.constant 0 : index
    %4 = vector.load %arg3[%c0_2, %c0_3] : memref<64x64xi8, #tpu.memory_space<vmem>>, vector<64x64xi8>
    %5 = arith.sitofp %4 : vector<64x64xi8> to vector<64x64xbf16>
    %cst = arith.constant dense<0.000000e+00> : vector<16x64xf32>
    %6 = tpu.matmul %3, %5, %cst {dimension_numbers = #tpu.dot_dimension_numbers<[1], [0], [0], [1], [0, 0, 1, 1], [], []>} : vector<16x64xbf16>, vector<64x64xbf16>, vector<16x64xf32> -> vector<16x64xf32>
    %c0_4 = arith.constant 0 : index
    %c0_5 = arith.constant 0 : index
    %7 = vector.load %arg7[%c0_4, %c0_5] : memref<16x1xf32, #tpu.memory_space<vmem>>, vector<16x1xf32>
    %8 = vector.broadcast %7 : vector<16x1xf32> to vector<16x64xf32>
    %9 = arith.mulf %6, %8 : vector<16x64xf32>
    %10 = arith.truncf %9 : vector<16x64xf32> to vector<16x64xbf16>
    %c0_6 = arith.constant 0 : index
    %c0_7 = arith.constant 0 : index
    %11 = vector.load %arg5[%c0_6, %c0_7] : memref<16x64xbf16, #tpu.memory_space<vmem>>, vector<16x64xbf16>
    tpu.vector_store %arg5[%c0_6, %c0_7], %10 {strides = array<i32>} : memref<16x64xbf16, #tpu.memory_space<vmem>>, vector<16x64xbf16>,
    return
  }
  func.func @transform_0(%arg0: i32, %arg1: i32) -> (i32, i32) {
    %c0_i32 = arith.constant 0 : i32
    %c0_i32_0 = arith.constant 0 : i32
    return %arg0, %c0_i32 : i32, i32
  }
  func.func @transform_1(%arg0: i32, %arg1: i32) -> (i32, i32) {
    %c0_i32 = arith.constant 0 : i32
    %c0_i32_0 = arith.constant 0 : i32
    return %c0_i32, %arg1 : i32, i32
  }
  func.func @transform_2(%arg0: i32, %arg1: i32) -> i32 {
    %c0_i32 = arith.constant 0 : i32
    %c0_i32_0 = arith.constant 0 : i32
    return %c0_i32 : i32
  }
  func.func @transform_3(%arg0: i32, %arg1: i32) -> (i32, i32) {
    %c0_i32 = arith.constant 0 : i32
    return %arg0, %arg1 : i32, i32
  }
}

module attributes {stable_mosaic.version = 11 : i64} {
  func.func @_gqa_attn_kernel(%arg0: i32, %arg1: i32, %arg2: memref<1x8x64xbf16, #tpu.memory_space<vmem>>, %arg3: memref<1x8x32xbf16, #tpu.memory_space<vmem>>, %arg4: memref<1x8x32xbf16, #tpu.memory_space<vmem>>, %arg5: memref<1x8x32xbf16, #tpu.memory_space<vmem>>) attributes {dimension_semantics = [#tpu.dimension_semantics<parallel>, #tpu.dimension_semantics<parallel>], iteration_bounds = array<i64: 2, 1>, scalar_prefetch = 0 : i64, scratch_operands = 0 : i64, tpu.core_type = #tpu.core_type<tc>, window_params = [{transform_indices = @transform_0, window_bounds = array<i64: 1, 8, 64>}, {transform_indices = @transform_1, window_bounds = array<i64: 1, 8, 32>}, {transform_indices = @transform_2, window_bounds = array<i64: 1, 8, 32>}, {transform_indices = @transform_3, window_bounds = array<i64: 1, 8, 32>}]} {
    %c0 = arith.constant 0 : index
    %c0_0 = arith.constant 0 : index
    %c0_1 = arith.constant 0 : index
    %0 = vector.load %arg2[%c0, %c0_0, %c0_1] : memref<1x8x64xbf16, #tpu.memory_space<vmem>>, vector<1x8x64xbf16>
    %1 = vector.shape_cast %0 : vector<1x8x64xbf16> to vector<8x64xbf16>
    %2 = arith.extf %1 : vector<8x64xbf16> to vector<8x64xf32>
    %c0_2 = arith.constant 0 : index
    %c0_3 = arith.constant 0 : index
    %c0_4 = arith.constant 0 : index
    %3 = vector.load %arg3[%c0_2, %c0_3, %c0_4] : memref<1x8x32xbf16, #tpu.memory_space<vmem>>, vector<1x8x32xbf16>
    %4 = vector.shape_cast %3 : vector<1x8x32xbf16> to vector<8x32xbf16>
    %c0_5 = arith.constant 0 : index
    %c0_6 = arith.constant 0 : index
    %c0_7 = arith.constant 0 : index
    %5 = vector.load %arg4[%c0_5, %c0_6, %c0_7] : memref<1x8x32xbf16, #tpu.memory_space<vmem>>, vector<1x8x32xbf16>
    %6 = vector.shape_cast %5 : vector<1x8x32xbf16> to vector<8x32xbf16>
    %7 = vector.extract_strided_slice %2 {offsets = [0, 0], sizes = [8, 8], strides = [1, 1]} : vector<8x64xf32> to vector<8x8xf32>
    %8 = vector.extract_strided_slice %2 {offsets = [0, 8], sizes = [8, 8], strides = [1, 1]} : vector<8x64xf32> to vector<8x8xf32>
    %9 = arith.addf %7, %8 : vector<8x8xf32>
    %10 = vector.extract_strided_slice %4 {offsets = [0, 0], sizes = [8, 8], strides = [1, 1]} : vector<8x32xbf16> to vector<8x8xbf16>
    %11 = vector.extract_strided_slice %6 {offsets = [0, 0], sizes = [8, 8], strides = [1, 1]} : vector<8x32xbf16> to vector<8x8xbf16>
    %12 = arith.truncf %9 : vector<8x8xf32> to vector<8x8xbf16>
    %cst = arith.constant dense<0.000000e+00> : vector<8x8xf32>
    %13 = tpu.matmul %12, %10, %cst {dimension_numbers = #tpu.dot_dimension_numbers<[1], [1], [0], [0], [0, 0, 1, 0], [], []>} : vector<8x8xbf16>, vector<8x8xbf16>, vector<8x8xf32> -> vector<8x8xf32>
    %cst_8 = arith.constant 1.250000e-01 : f32
    %14 = vector.broadcast %cst_8 : f32 to vector<8x8xf32>
    %15 = arith.mulf %13, %14 : vector<8x8xf32>
    %cst_9 = arith.constant dense<0xFF800000> : vector<8xf32>
    %16 = vector.multi_reduction <maximumf>, %15, %cst_9 [1] : vector<8x8xf32> to vector<8xf32>
    %17 = vector.shape_cast %16 : vector<8xf32> to vector<8x1xf32>
    %18 = vector.broadcast %17 : vector<8x1xf32> to vector<8x8xf32>
    %19 = arith.subf %15, %18 : vector<8x8xf32>
    %20 = math.exp %19 : vector<8x8xf32>
    %cst_10 = arith.constant dense<0.000000e+00> : vector<8xf32>
    %21 = vector.multi_reduction <add>, %20, %cst_10 [1] : vector<8x8xf32> to vector<8xf32>
    %22 = vector.shape_cast %21 : vector<8xf32> to vector<8x1xf32>
    %23 = tpu.reciprocal %22 {approx = true} : vector<8x1xf32> -> vector<8x1xf32>
    %24 = vector.broadcast %23 : vector<8x1xf32> to vector<8x8xf32>
    %25 = arith.mulf %20, %24 : vector<8x8xf32>
    %26 = arith.truncf %25 : vector<8x8xf32> to vector<8x8xbf16>
    %cst_11 = arith.constant dense<0.000000e+00> : vector<8x8xf32>
    %27 = tpu.matmul %26, %11, %cst_11 {dimension_numbers = #tpu.dot_dimension_numbers<[1], [0], [0], [1], [0, 0, 1, 1], [], []>} : vector<8x8xbf16>, vector<8x8xbf16>, vector<8x8xf32> -> vector<8x8xf32>
    %28 = vector.extract_strided_slice %2 {offsets = [0, 16], sizes = [8, 8], strides = [1, 1]} : vector<8x64xf32> to vector<8x8xf32>
    %29 = vector.extract_strided_slice %2 {offsets = [0, 24], sizes = [8, 8], strides = [1, 1]} : vector<8x64xf32> to vector<8x8xf32>
    %30 = arith.addf %28, %29 : vector<8x8xf32>
    %31 = vector.extract_strided_slice %4 {offsets = [0, 8], sizes = [8, 8], strides = [1, 1]} : vector<8x32xbf16> to vector<8x8xbf16>
    %32 = vector.extract_strided_slice %6 {offsets = [0, 8], sizes = [8, 8], strides = [1, 1]} : vector<8x32xbf16> to vector<8x8xbf16>
    %33 = arith.truncf %30 : vector<8x8xf32> to vector<8x8xbf16>
    %cst_12 = arith.constant dense<0.000000e+00> : vector<8x8xf32>
    %34 = tpu.matmul %33, %31, %cst_12 {dimension_numbers = #tpu.dot_dimension_numbers<[1], [1], [0], [0], [0, 0, 1, 0], [], []>} : vector<8x8xbf16>, vector<8x8xbf16>, vector<8x8xf32> -> vector<8x8xf32>
    %cst_13 = arith.constant 1.250000e-01 : f32
    %35 = vector.broadcast %cst_13 : f32 to vector<8x8xf32>
    %36 = arith.mulf %34, %35 : vector<8x8xf32>
    %cst_14 = arith.constant dense<0xFF800000> : vector<8xf32>
    %37 = vector.multi_reduction <maximumf>, %36, %cst_14 [1] : vector<8x8xf32> to vector<8xf32>
    %38 = vector.shape_cast %37 : vector<8xf32> to vector<8x1xf32>
    %39 = vector.broadcast %38 : vector<8x1xf32> to vector<8x8xf32>
    %40 = arith.subf %36, %39 : vector<8x8xf32>
    %41 = math.exp %40 : vector<8x8xf32>
    %cst_15 = arith.constant dense<0.000000e+00> : vector<8xf32>
    %42 = vector.multi_reduction <add>, %41, %cst_15 [1] : vector<8x8xf32> to vector<8xf32>
    %43 = vector.shape_cast %42 : vector<8xf32> to vector<8x1xf32>
    %44 = tpu.reciprocal %43 {approx = true} : vector<8x1xf32> -> vector<8x1xf32>
    %45 = vector.broadcast %44 : vector<8x1xf32> to vector<8x8xf32>
    %46 = arith.mulf %41, %45 : vector<8x8xf32>
    %47 = arith.truncf %46 : vector<8x8xf32> to vector<8x8xbf16>
    %cst_16 = arith.constant dense<0.000000e+00> : vector<8x8xf32>
    %48 = tpu.matmul %47, %32, %cst_16 {dimension_numbers = #tpu.dot_dimension_numbers<[1], [0], [0], [1], [0, 0, 1, 1], [], []>} : vector<8x8xbf16>, vector<8x8xbf16>, vector<8x8xf32> -> vector<8x8xf32>
    %49 = vector.extract_strided_slice %2 {offsets = [0, 32], sizes = [8, 8], strides = [1, 1]} : vector<8x64xf32> to vector<8x8xf32>
    %50 = vector.extract_strided_slice %2 {offsets = [0, 40], sizes = [8, 8], strides = [1, 1]} : vector<8x64xf32> to vector<8x8xf32>
    %51 = arith.addf %49, %50 : vector<8x8xf32>
    %52 = vector.extract_strided_slice %4 {offsets = [0, 16], sizes = [8, 8], strides = [1, 1]} : vector<8x32xbf16> to vector<8x8xbf16>
    %53 = vector.extract_strided_slice %6 {offsets = [0, 16], sizes = [8, 8], strides = [1, 1]} : vector<8x32xbf16> to vector<8x8xbf16>
    %54 = arith.truncf %51 : vector<8x8xf32> to vector<8x8xbf16>
    %cst_17 = arith.constant dense<0.000000e+00> : vector<8x8xf32>
    %55 = tpu.matmul %54, %52, %cst_17 {dimension_numbers = #tpu.dot_dimension_numbers<[1], [1], [0], [0], [0, 0, 1, 0], [], []>} : vector<8x8xbf16>, vector<8x8xbf16>, vector<8x8xf32> -> vector<8x8xf32>
    %cst_18 = arith.constant 1.250000e-01 : f32
    %56 = vector.broadcast %cst_18 : f32 to vector<8x8xf32>
    %57 = arith.mulf %55, %56 : vector<8x8xf32>
    %cst_19 = arith.constant dense<0xFF800000> : vector<8xf32>
    %58 = vector.multi_reduction <maximumf>, %57, %cst_19 [1] : vector<8x8xf32> to vector<8xf32>
    %59 = vector.shape_cast %58 : vector<8xf32> to vector<8x1xf32>
    %60 = vector.broadcast %59 : vector<8x1xf32> to vector<8x8xf32>
    %61 = arith.subf %57, %60 : vector<8x8xf32>
    %62 = math.exp %61 : vector<8x8xf32>
    %cst_20 = arith.constant dense<0.000000e+00> : vector<8xf32>
    %63 = vector.multi_reduction <add>, %62, %cst_20 [1] : vector<8x8xf32> to vector<8xf32>
    %64 = vector.shape_cast %63 : vector<8xf32> to vector<8x1xf32>
    %65 = tpu.reciprocal %64 {approx = true} : vector<8x1xf32> -> vector<8x1xf32>
    %66 = vector.broadcast %65 : vector<8x1xf32> to vector<8x8xf32>
    %67 = arith.mulf %62, %66 : vector<8x8xf32>
    %68 = arith.truncf %67 : vector<8x8xf32> to vector<8x8xbf16>
    %cst_21 = arith.constant dense<0.000000e+00> : vector<8x8xf32>
    %69 = tpu.matmul %68, %53, %cst_21 {dimension_numbers = #tpu.dot_dimension_numbers<[1], [0], [0], [1], [0, 0, 1, 1], [], []>} : vector<8x8xbf16>, vector<8x8xbf16>, vector<8x8xf32> -> vector<8x8xf32>
    %70 = vector.extract_strided_slice %2 {offsets = [0, 48], sizes = [8, 8], strides = [1, 1]} : vector<8x64xf32> to vector<8x8xf32>
    %71 = vector.extract_strided_slice %2 {offsets = [0, 56], sizes = [8, 8], strides = [1, 1]} : vector<8x64xf32> to vector<8x8xf32>
    %72 = arith.addf %70, %71 : vector<8x8xf32>
    %73 = vector.extract_strided_slice %4 {offsets = [0, 24], sizes = [8, 8], strides = [1, 1]} : vector<8x32xbf16> to vector<8x8xbf16>
    %74 = vector.extract_strided_slice %6 {offsets = [0, 24], sizes = [8, 8], strides = [1, 1]} : vector<8x32xbf16> to vector<8x8xbf16>
    %75 = arith.truncf %72 : vector<8x8xf32> to vector<8x8xbf16>
    %cst_22 = arith.constant dense<0.000000e+00> : vector<8x8xf32>
    %76 = tpu.matmul %75, %73, %cst_22 {dimension_numbers = #tpu.dot_dimension_numbers<[1], [1], [0], [0], [0, 0, 1, 0], [], []>} : vector<8x8xbf16>, vector<8x8xbf16>, vector<8x8xf32> -> vector<8x8xf32>
    %cst_23 = arith.constant 1.250000e-01 : f32
    %77 = vector.broadcast %cst_23 : f32 to vector<8x8xf32>
    %78 = arith.mulf %76, %77 : vector<8x8xf32>
    %cst_24 = arith.constant dense<0xFF800000> : vector<8xf32>
    %79 = vector.multi_reduction <maximumf>, %78, %cst_24 [1] : vector<8x8xf32> to vector<8xf32>
    %80 = vector.shape_cast %79 : vector<8xf32> to vector<8x1xf32>
    %81 = vector.broadcast %80 : vector<8x1xf32> to vector<8x8xf32>
    %82 = arith.subf %78, %81 : vector<8x8xf32>
    %83 = math.exp %82 : vector<8x8xf32>
    %cst_25 = arith.constant dense<0.000000e+00> : vector<8xf32>
    %84 = vector.multi_reduction <add>, %83, %cst_25 [1] : vector<8x8xf32> to vector<8xf32>
    %85 = vector.shape_cast %84 : vector<8xf32> to vector<8x1xf32>
    %86 = tpu.reciprocal %85 {approx = true} : vector<8x1xf32> -> vector<8x1xf32>
    %87 = vector.broadcast %86 : vector<8x1xf32> to vector<8x8xf32>
    %88 = arith.mulf %83, %87 : vector<8x8xf32>
    %89 = arith.truncf %88 : vector<8x8xf32> to vector<8x8xbf16>
    %cst_26 = arith.constant dense<0.000000e+00> : vector<8x8xf32>
    %90 = tpu.matmul %89, %74, %cst_26 {dimension_numbers = #tpu.dot_dimension_numbers<[1], [0], [0], [1], [0, 0, 1, 1], [], []>} : vector<8x8xbf16>, vector<8x8xbf16>, vector<8x8xf32> -> vector<8x8xf32>
    %91 = tpu.concatenate %27, %48, %69, %90 in 1 : vector<8x8xf32>, vector<8x8xf32>, vector<8x8xf32>, vector<8x8xf32> -> vector<8x32xf32>
    %92 = arith.truncf %91 : vector<8x32xf32> to vector<8x32xbf16>
    %c0_27 = arith.constant 0 : index
    %c0_28 = arith.constant 0 : index
    %c0_29 = arith.constant 0 : index
    %93 = vector.load %arg5[%c0_27, %c0_28, %c0_29] : memref<1x8x32xbf16, #tpu.memory_space<vmem>>, vector<1x8x32xbf16>
    %94 = vector.shape_cast %93 : vector<1x8x32xbf16> to vector<8x32xbf16>
    %95 = vector.shape_cast %92 : vector<8x32xbf16> to vector<1x8x32xbf16>
    tpu.vector_store %arg5[%c0_27, %c0_28, %c0_29], %95 {strides = array<i32>} : memref<1x8x32xbf16, #tpu.memory_space<vmem>>, vector<1x8x32xbf16>,
    return
  }
  func.func @transform_0(%arg0: i32, %arg1: i32) -> (i32, i32, i32) {
    %c0_i32 = arith.constant 0 : i32
    %c0_i32_0 = arith.constant 0 : i32
    return %arg0, %arg1, %c0_i32 : i32, i32, i32
  }
  func.func @transform_1(%arg0: i32, %arg1: i32) -> (i32, i32, i32) {
    %c0_i32 = arith.constant 0 : i32
    %c0_i32_0 = arith.constant 0 : i32
    %c0_i32_1 = arith.constant 0 : i32
    return %arg0, %c0_i32, %c0_i32_0 : i32, i32, i32
  }
  func.func @transform_2(%arg0: i32, %arg1: i32) -> (i32, i32, i32) {
    %c0_i32 = arith.constant 0 : i32
    %c0_i32_0 = arith.constant 0 : i32
    %c0_i32_1 = arith.constant 0 : i32
    return %arg0, %c0_i32, %c0_i32_0 : i32, i32, i32
  }
  func.func @transform_3(%arg0: i32, %arg1: i32) -> (i32, i32, i32) {
    %c0_i32 = arith.constant 0 : i32
    %c0_i32_0 = arith.constant 0 : i32
    return %arg0, %arg1, %c0_i32 : i32, i32, i32
  }
}

module attributes {stable_mosaic.version = 11 : i64} {
  func.func @_bitlinear_ln_kernel(%arg0: i32, %arg1: i32, %arg2: memref<16x32xbf16, #tpu.memory_space<vmem>>, %arg3: memref<1x32xf32, #tpu.memory_space<vmem>>, %arg4: memref<1x32xf32, #tpu.memory_space<vmem>>, %arg5: memref<32x64xi8, #tpu.memory_space<vmem>>, %arg6: memref<1xf32, #tpu.memory_space<smem>>, %arg7: memref<16x64xf32, #tpu.memory_space<vmem>>, %arg8: memref<16x32xbf16, #tpu.memory_space<vmem>>, %arg9: memref<16x1xf32, #tpu.memory_space<vmem>>) attributes {dimension_semantics = [#tpu.dimension_semantics<parallel>, #tpu.dimension_semantics<arbitrary>], iteration_bounds = array<i64: 1, 1>, scalar_prefetch = 0 : i64, scratch_operands = 2 : i64, tpu.core_type = #tpu.core_type<tc>, window_params = [{transform_indices = @transform_0, window_bounds = array<i64: 16, 32>}, {pipeline_mode = #tpu.pipeline_mode<synchronous>, transform_indices = @transform_1, window_bounds = array<i64: 1, 32>}, {pipeline_mode = #tpu.pipeline_mode<synchronous>, transform_indices = @transform_2, window_bounds = array<i64: 1, 32>}, {transform_indices = @transform_3, window_bounds = array<i64: 32, 64>}, {transform_indices = @transform_4, window_bounds = array<i64: 1>}, {transform_indices = @transform_5, window_bounds = array<i64: 16, 64>}]} {
    %c0_i32 = arith.constant 0 : i32
    %0 = arith.cmpi eq, %arg1, %c0_i32 : i32
    %1 = arith.extui %0 : i1 to i32
    %c0_i32_0 = arith.constant 0 : i32
    %2 = arith.cmpi ne, %1, %c0_i32_0 : i32
    scf.if %2 {
      %c0_8 = arith.constant 0 : index
      %c0_9 = arith.constant 0 : index
      %11 = vector.load %arg2[%c0_8, %c0_9] : memref<16x32xbf16, #tpu.memory_space<vmem>>, vector<16x32xbf16>
      %12 = arith.extf %11 : vector<16x32xbf16> to vector<16x32xf32>
      %cst_10 = arith.constant dense<0.000000e+00> : vector<16xf32>
      %13 = vector.multi_reduction <add>, %12, %cst_10 [1] : vector<16x32xf32> to vector<16xf32>
      %14 = vector.shape_cast %13 : vector<16xf32> to vector<16x1xf32>
      %cst_11 = arith.constant 3.200000e+01 : f32
      %15 = vector.broadcast %cst_11 : f32 to vector<16x1xf32>
      %16 = arith.divf %14, %15 : vector<16x1xf32>
      %17 = vector.broadcast %16 : vector<16x1xf32> to vector<16x32xf32>
      %18 = arith.subf %12, %17 : vector<16x32xf32>
      %19 = arith.mulf %18, %18 : vector<16x32xf32>
      %cst_12 = arith.constant dense<0.000000e+00> : vector<16xf32>
      %20 = vector.multi_reduction <add>, %19, %cst_12 [1] : vector<16x32xf32> to vector<16xf32>
      %21 = vector.shape_cast %20 : vector<16xf32> to vector<16x1xf32>
      %cst_13 = arith.constant 3.200000e+01 : f32
      %22 = vector.broadcast %cst_13 : f32 to vector<16x1xf32>
      %23 = arith.divf %21, %22 : vector<16x1xf32>
      %cst_14 = arith.constant 9.99999974E-6 : f32
      %24 = vector.broadcast %cst_14 : f32 to vector<16x1xf32>
      %25 = arith.addf %23, %24 : vector<16x1xf32>
      %26 = math.rsqrt %25 : vector<16x1xf32>
      %27 = vector.broadcast %26 : vector<16x1xf32> to vector<16x32xf32>
      %28 = arith.mulf %18, %27 : vector<16x32xf32>
      %c0_15 = arith.constant 0 : index
      %c0_16 = arith.constant 0 : index
      %29 = vector.load %arg3[%c0_15, %c0_16] : memref<1x32xf32, #tpu.memory_space<vmem>>, vector<1x32xf32>
      %30 = vector.broadcast %29 : vector<1x32xf32> to vector<16x32xf32>
      %31 = arith.mulf %28, %30 : vector<16x32xf32>
      %c0_17 = arith.constant 0 : index
      %c0_18 = arith.constant 0 : index
      %32 = vector.load %arg4[%c0_17, %c0_18] : memref<1x32xf32, #tpu.memory_space<vmem>>, vector<1x32xf32>
      %33 = vector.broadcast %32 : vector<1x32xf32> to vector<16x32xf32>
      %34 = arith.addf %31, %33 : vector<16x32xf32>
      %35 = arith.mulf %34, %34 : vector<16x32xf32>
      %cst_19 = arith.constant dense<0.000000e+00> : vector<16xf32>
      %36 = vector.multi_reduction <add>, %35, %cst_19 [1] : vector<16x32xf32> to vector<16xf32>
      %37 = vector.shape_cast %36 : vector<16xf32> to vector<16x1xf32>
      %cst_20 = arith.constant 1.000000e-24 : f32
      %38 = vector.broadcast %cst_20 : f32 to vector<16x1xf32>
      %39 = arith.maximumf %37, %38 : vector<16x1xf32>
      %40 = math.rsqrt %39 : vector<16x1xf32>
      %cst_21 = arith.constant 5.65685415 : f32
      %41 = vector.broadcast %cst_21 : f32 to vector<16x1xf32>
      %42 = arith.mulf %40, %41 : vector<16x1xf32>
      %43 = math.absf %34 : vector<16x32xf32>
      %cst_22 = arith.constant dense<0xFF800000> : vector<16xf32>
      %44 = vector.multi_reduction <maximumf>, %43, %cst_22 [1] : vector<16x32xf32> to vector<16xf32>
      %45 = vector.shape_cast %44 : vector<16xf32> to vector<16x1xf32>
      %46 = arith.mulf %42, %45 : vector<16x1xf32>
      %cst_23 = arith.constant 9.99999974E-6 : f32
      %47 = vector.broadcast %cst_23 : f32 to vector<16x1xf32>
      %48 = arith.maximumf %46, %47 : vector<16x1xf32>
      %cst_24 = arith.constant 1.270000e+02 : f32
      %49 = vector.broadcast %cst_24 : f32 to vector<16x1xf32>
      %50 = arith.divf %49, %48 : vector<16x1xf32>
      %51 = arith.mulf %42, %50 : vector<16x1xf32>
      %52 = vector.broadcast %51 : vector<16x1xf32> to vector<16x32xf32>
      %53 = arith.mulf %34, %52 : vector<16x32xf32>
      %54 = math.roundeven %53 : vector<16x32xf32>
      %cst_25 = arith.constant -1.280000e+02 : f32
      %cst_26 = arith.constant 1.270000e+02 : f32
      %55 = vector.broadcast %cst_25 : f32 to vector<16x32xf32>
      %56 = arith.maximumf %55, %54 : vector<16x32xf32>
      %57 = vector.broadcast %cst_26 : f32 to vector<16x32xf32>
      %58 = arith.minimumf %57, %56 : vector<16x32xf32>
      %59 = arith.truncf %58 : vector<16x32xf32> to vector<16x32xbf16>
      %c0_27 = arith.constant 0 : index
      %c0_28 = arith.constant 0 : index
      %60 = vector.load %arg8[%c0_27, %c0_28] : memref<16x32xbf16, #tpu.memory_space<vmem>>, vector<16x32xbf16>
      tpu.vector_store %arg8[%c0_27, %c0_28], %59 {strides = array<i32>} : memref<16x32xbf16, #tpu.memory_space<vmem>>, vector<16x32xbf16>,
      %c0_29 = arith.constant 0 : index
      %61 = memref.load %arg6[%c0_29] : memref<1xf32, #tpu.memory_space<smem>>
      %cst_30 = arith.constant 0.00787401571 : f32
      %62 = arith.mulf %61, %cst_30 : f32
      %63 = vector.broadcast %62 : f32 to vector<16x1xf32>
      %64 = arith.mulf %48, %63 : vector<16x1xf32>
      %c0_31 = arith.constant 0 : index
      %c0_32 = arith.constant 0 : index
      %65 = vector.load %arg9[%c0_31, %c0_32] : memref<16x1xf32, #tpu.memory_space<vmem>>, vector<16x1xf32>
      tpu.vector_store %arg9[%c0_31, %c0_32], %64 {strides = array<i32>} : memref<16x1xf32, #tpu.memory_space<vmem>>, vector<16x1xf32>,
    } else {
    }
    %c0 = arith.constant 0 : index
    %c0_1 = arith.constant 0 : index
    %3 = vector.load %arg8[%c0, %c0_1] : memref<16x32xbf16, #tpu.memory_space<vmem>>, vector<16x32xbf16>
    %c0_2 = arith.constant 0 : index
    %c0_3 = arith.constant 0 : index
    %4 = vector.load %arg5[%c0_2, %c0_3] : memref<32x64xi8, #tpu.memory_space<vmem>>, vector<32x64xi8>
    %5 = arith.sitofp %4 : vector<32x64xi8> to vector<32x64xbf16>
    %cst = arith.constant dense<0.000000e+00> : vector<16x64xf32>
    %6 = tpu.matmul %3, %5, %cst {dimension_numbers = #tpu.dot_dimension_numbers<[1], [0], [0], [1], [0, 0, 1, 1], [], []>} : vector<16x32xbf16>, vector<32x64xbf16>, vector<16x64xf32> -> vector<16x64xf32>
    %c0_4 = arith.constant 0 : index
    %c0_5 = arith.constant 0 : index
    %7 = vector.load %arg9[%c0_4, %c0_5] : memref<16x1xf32, #tpu.memory_space<vmem>>, vector<16x1xf32>
    %8 = vector.broadcast %7 : vector<16x1xf32> to vector<16x64xf32>
    %9 = arith.mulf %6, %8 : vector<16x64xf32>
    %c0_6 = arith.constant 0 : index
    %c0_7 = arith.constant 0 : index
    %10 = vector.load %arg7[%c0_6, %c0_7] : memref<16x64xf32, #tpu.memory_space<vmem>>, vector<16x64xf32>
    tpu.vector_store %arg7[%c0_6, %c0_7], %9 {strides = array<i32>} : memref<16x64xf32, #tpu.memory_space<vmem>>, vector<16x64xf32>,
    return
  }
  func.func @transform_0(%arg0: i32, %arg1: i32) -> (i32, i32) {
    %c0_i32 = arith.constant 0 : i32
    %c0_i32_0 = arith.constant 0 : i32
    return %arg0, %c0_i32 : i32, i32
  }
  func.func @transform_1(%arg0: i32, %arg1: i32) -> (i32, i32) {
    %c0_i32 = arith.constant 0 : i32
    %c0_i32_0 = arith.constant 0 : i32
    %c0_i32_1 = arith.constant 0 : i32
    return %c0_i32, %c0_i32_0 : i32, i32
  }
  func.func @transform_2(%arg0: i32, %arg1: i32) -> (i32, i32) {
    %c0_i32 = arith.constant 0 : i32
    %c0_i32_0 = arith.constant 0 : i32
    %c0_i32_1 = arith.constant 0 : i32
    return %c0_i32, %c0_i32_0 : i32, i32
  }
  func.func @transform_3(%arg0: i32, %arg1: i32) -> (i32, i32) {
    %c0_i32 = arith.constant 0 : i32
    %c0_i32_0 = arith.constant 0 : i32
    return %c0_i32, %arg1 : i32, i32
  }
  func.func @transform_4(%arg0: i32, %arg1: i32) -> i32 {
    %c0_i32 = arith.constant 0 : i32
    %c0_i32_0 = arith.constant 0 : i32
    return %c0_i32 : i32
  }
  func.func @transform_5(%arg0: i32, %arg1: i32) -> (i32, i32) {
    %c0_i32 = arith.constant 0 : i32
    return %arg0, %arg1 : i32, i32
  }
}

</mosaic_0001>

<bundles_post_ra>
// kernel: bit_mgqa_forward.5
= control target key start
LH: loop header
LB: loop body
LE: loop exit
PB: predicated region body
PF: predicated region fallthrough
CT: control target
= control target key end

     0   :  { %vm24_vm0 = vcmask 523264   ;;  %v191_v10 = vmov 0   ;;  %v192_v13 = vmov 0.0   ;;  %vm193_vm1 = vmmov 0   ;;  %s253_s0 = inlined_call_operand.vmem [shape: f32[16,64], index: 0, kind: input, shape index: {}]   ;;  %s254_s1 = inlined_call_operand.vmem [shape: s8[64,64], index: 1, kind: input, shape index: {}]   ;;  %s255_s2 = inlined_call_operand.<no memory space> [shape: f32[1], index: 2, kind: input, shape index: {}]   ;;  %s256_s3 = inlined_call_operand.vmem [shape: bf16[16,64], index: 3, kind: output, shape index: {}]  }
   0x1   :  { %v217_v0 = vld [vmem:[%s253_s0] sm:$0xff]  ;;  %v222_v1 = vld [vmem:[%s253_s0 + $0x8] sm:$0xff]  ;;  %181 = vset.pattern.permute.xlu0 %v191_v10  ;;  %182 = vset.pattern.permute.xlu1 %v191_v10  ;;  %vm70_vm2 = vcmask 7168   ;;  %vm147_vm3 = vcmask 519168  }
   0x2   :  { %v22_v2 = vmul.f32 %v217_v0, %v217_v0  ;;  %v23_v3 = vmul.f32 %v222_v1, %v222_v1  ;;  %v37_v4 = vand.u32 2147483647, %v217_v0  ;;  %v38_v5 = vand.u32 2147483647, %v222_v1  ;;  %v74_v11 = vld [vmem:[%s254_s1] sm:$0xff]  ;;  %164 = vmatprep.subr.bf16.mxu0 %v192_v13  ;;  %v75_v15 = vld [vmem:[%s254_s1 + $0x8] sm:$0xff]  ;;  %172 = vmatprep.mubr.msk.bf16.mxu0 %vm193_vm1, %v192_v13 }
   0x3   :  { %v76_v12 = vunpack.c.l.s8.bf16 %v74_v11  ;;  %v77_v14 = vunpack.c.h.s8.bf16 %v74_v11  ;;  %v78_v16 = vunpack.c.l.s8.bf16 %v75_v15  ;;  %v79_v17 = vunpack.c.h.s8.bf16 %v75_v15  ;;  %s66_s1 = smul.f32 0.007874016, %s255_s2 }
   0x4   :  { %v25_v6 = vsel %vm24_vm0, %v22_v2, 0.0  ;;  %v39_v7 = vsel %vm24_vm0, %v37_v4, -inf  ;;  %v28_v8 = vsel %vm24_vm0, %v23_v3, 0.0  ;;  %v42_v9 = vsel %vm24_vm0, %v38_v5, -inf }
   0x5   :  { %26 = vadd.xlane.f32.xlu0 %v25_v6  ;;  %40 = vmax.xlane.f32.xlu1 %v39_v7  ;;  %v67_v27 = vstv %s66_s1 }
   0x6   :  { %165 = vmatpush3.bf16.msra.mxu0 %v76_v12 }
   0x7   :  { %166 = vmatprep.subr.bf16.mxu0 %v192_v13 }
   0x9   :  { %29 = vadd.xlane.f32.xlu0 %v28_v8  ;;  %43 = vmax.xlane.f32.xlu1 %v42_v9 }
   0xa   :  { %167 = vmatpush3.bf16.msra.mxu0 %v77_v14 }
   0xb   :  { %168 = vmatprep.subr.bf16.mxu0 %v192_v13 }
   0xe   :  { %169 = vmatpush3.bf16.msra.mxu0 %v78_v16 }
   0xf   :  { %170 = vmatprep.subr.bf16.mxu0 %v192_v13 }
  0x12   :  { %171 = vmatpush3.bf16.msra.mxu0 %v79_v17 }
  0x92   :  { %v27_v18 = vpop.xlane.xlu0 %26  ;;  %v41_v22 = vpop.xlane.xlu1 %40 }
  0x93   :  { %v31_v19 = vmax.f32 %v27_v18, 1e-24 }
  0x95   :  { %183 = vrsqrt.f32 %v31_v19 }
  0x96   :  { %v30_v20 = vpop.xlane.xlu0 %29  ;;  %v44_v28 = vpop.xlane.xlu1 %43 }
  0x97   :  { %v32_v21 = vmax.f32 %v30_v20, 1e-24 }
  0x99   :  { %185 = vrsqrt.f32 %v32_v21 }
  0x9f   :  { %v184_v23 = vpop.eup %183 }
  0xa0   :  { %v35_v24 = vmul.f32 8.0, %v184_v23 }
  0xa2   :  { %v45_v25 = vmul.f32 %v41_v22, %v35_v24 }
  0xa3   :  { %v186_v26 = vpop.eup %185 }
  0xa4   :  { %v47_v29 = vmax.f32 %v45_v25, 1e-05  ;;  %v36_v30 = vmul.f32 8.0, %v186_v26 }
  0xa6   :  { %187 = vrcp.f32 %v47_v29  ;;  %v68_v31 = vmul.f32 %v67_v27, %v47_v29  ;;  %v46_v32 = vmul.f32 %v44_v28, %v36_v30 }
  0xa8   :  { %71 = vst.msk [vmem:[#allocation3] sm:$0xff] %vm70_vm2, %v68_v31  ;;  %v48_v33 = vmax.f32 %v46_v32, 1e-05 }
  0xaa   :  { %189 = vrcp.f32 %v48_v33  ;;  %v69_v34 = vmul.f32 %v67_v27, %v48_v33 }
  0xac   :  { %72 = vst.msk [vmem:[#allocation3 + $0x8] sm:$0xff] %vm70_vm2, %v69_v34 }
  0xaf   :  { %v125_v35 = vld [vmem:[#allocation3] sm:$0xff] }
  0xb0   :  { %v188_v36 = vpop.eup %187  ;;  %129 = vperm.xlu0 %181, %v125_v35  }
  0xb1   :  { %v50_v37 = vmul.f32 127.0, %v188_v36 }
  0xb3   :  { %v53_v38 = vmul.f32 %v50_v37, %v35_v24  ;;  %v126_v39 = vld [vmem:[#allocation3 + $0x8] sm:$0xff] }
  0xb4   :  { %v190_v40 = vpop.eup %189  ;;  %134 = vperm.xlu1 %182, %v126_v39  }
  0xb5   :  { %v55_v41 = vmul.f32 %v53_v38, %v217_v0  ;;  %v52_v42 = vmul.f32 127.0, %v190_v40 }
  0xb7   :  { %v176_v43 = vround.rtne.f32 %v55_v41  ;;  %v54_v44 = vmul.f32 %v52_v42, %v36_v30 }
  0xb9   :  { %v56_v45 = vmul.f32 %v54_v44, %v222_v1  ;;  %v59_v46 = vmax.f32 %v176_v43, -128.0 }
  0xbb   :  { %v177_v47 = vround.rtne.f32 %v56_v45  ;;  %v61_v49 = vmin.f32 %v59_v46, 127.0 }
  0xbd   :  { %v60_v48 = vmax.f32 %v177_v47, -128.0 }
  0xbf   :  { %v62_v50 = vmin.f32 %v60_v48, 127.0 }
  0xc1   :  { %v63_v51 = vpack.c.bf16 %v62_v50, %v61_v49 }
  0xc3   :  { %64 = vst.msk [vmem:[#allocation2] sm:$0xff] %vm24_vm0, %v63_v51 }
  0xca   :  { %v73_v52 = vld [vmem:[#allocation2] sm:$0xff] }
  0xcb   :  { %173 = vmatmul.mubr.msk.bf16.vlgmr.msra.gmra.mrb[0].mxu0 %vm24_vm0, %v73_v52 }
 0x12f   :  { %v130_v53 = vpop.permute.xlu0 %129 }
 0x133   :  { %v135_v57 = vpop.permute.xlu1 %134 }
 0x19e   :  { %v118_v54 = vpop.f32.mrb[0].mxu0 }
 0x19f   :  { %v137_v55 = vmul.f32 %v130_v53, %v118_v54  ;;  %v174_v56 = vpop.f32.mrb[1].mxu0 }
 0x1a0   :  { %v121_v58 = vpop.f32.mrb[2].mxu0 }
 0x1a1   :  { %v157_v59 = vpack.c.bf16 %v137_v55, %v137_v55  ;;  %v138_v60 = vmul.f32 %v135_v57, %v121_v58  ;;  %v175_v61 = vpop.f32.mrb[3].mxu0 }
 0x1a3   :  { %148 = vst.msk [vmem:[%s256_s3] sm:$0xf] %vm147_vm3, %v157_v59  ;;  %v158_v62 = vpack.c.bf16 %v138_v60, %v138_v60 }
 0x1a5   :  { %149 = vst.msk [vmem:[%s256_s3 + $0x4] sm:$0xf] %vm147_vm3, %v158_v62 }

// kernel: bit_mgqa_forward.6
= control target key start
LH: loop header
LB: loop body
LE: loop exit
PB: predicated region body
PF: predicated region fallthrough
CT: control target
= control target key end

     0   :  { %vm24_vm0 = vcmask 523264   ;;  %v191_v10 = vmov 0   ;;  %v192_v13 = vmov 0.0   ;;  %vm193_vm1 = vmmov 0   ;;  %s253_s0 = inlined_call_operand.vmem [shape: f32[16,64], index: 0, kind: input, shape index: {}]   ;;  %s254_s1 = inlined_call_operand.vmem [shape: s8[64,32], index: 1, kind: input, shape index: {}]   ;;  %s255_s2 = inlined_call_operand.<no memory space> [shape: f32[1], index: 2, kind: input, shape index: {}]   ;;  %s256_s3 = inlined_call_operand.vmem [shape: bf16[16,32], index: 3, kind: output, shape index: {}]  }
   0x1   :  { %v217_v0 = vld [vmem:[%s253_s0] sm:$0xff]  ;;  %v222_v1 = vld [vmem:[%s253_s0 + $0x8] sm:$0xff]  ;;  %181 = vset.pattern.permute.xlu0 %v191_v10  ;;  %182 = vset.pattern.permute.xlu1 %v191_v10  ;;  %vm70_vm2 = vcmask 7168   ;;  %vm147_vm3 = vcmask 257024  }
   0x2   :  { %v22_v2 = vmul.f32 %v217_v0, %v217_v0  ;;  %v23_v3 = vmul.f32 %v222_v1, %v222_v1  ;;  %v37_v4 = vand.u32 2147483647, %v217_v0  ;;  %v38_v5 = vand.u32 2147483647, %v222_v1  ;;  %v74_v11 = vld [vmem:[%s254_s1] sm:$0xff]  ;;  %164 = vmatprep.subr.bf16.mxu0 %v192_v13  ;;  %v75_v15 = vld [vmem:[%s254_s1 + $0x8] sm:$0xff]  ;;  %172 = vmatprep.mubr.msk.bf16.mxu0 %vm193_vm1, %v192_v13 }
   0x3   :  { %v76_v12 = vunpack.c.l.s8.bf16 %v74_v11  ;;  %v77_v14 = vunpack.c.h.s8.bf16 %v74_v11  ;;  %v78_v16 = vunpack.c.l.s8.bf16 %v75_v15  ;;  %v79_v17 = vunpack.c.h.s8.bf16 %v75_v15  ;;  %s66_s1 = smul.f32 0.007874016, %s255_s2 }
   0x4   :  { %v25_v6 = vsel %vm24_vm0, %v22_v2, 0.0  ;;  %v39_v7 = vsel %vm24_vm0, %v37_v4, -inf  ;;  %v28_v8 = vsel %vm24_vm0, %v23_v3, 0.0  ;;  %v42_v9 = vsel %vm24_vm0, %v38_v5, -inf }
   0x5   :  { %26 = vadd.xlane.f32.xlu0 %v25_v6  ;;  %40 = vmax.xlane.f32.xlu1 %v39_v7  ;;  %v67_v27 = vstv %s66_s1 }
   0x6   :  { %165 = vmatpush3.bf16.msra.mxu0 %v76_v12 }
   0x7   :  { %166 = vmatprep.subr.bf16.mxu0 %v192_v13 }
   0x9   :  { %29 = vadd.xlane.f32.xlu0 %v28_v8  ;;  %43 = vmax.xlane.f32.xlu1 %v42_v9 }
   0xa   :  { %167 = vmatpush3.bf16.msra.mxu0 %v77_v14 }
   0xb   :  { %168 = vmatprep.subr.bf16.mxu0 %v192_v13 }
   0xe   :  { %169 = vmatpush3.bf16.msra.mxu0 %v78_v16 }
   0xf   :  { %170 = vmatprep.subr.bf16.mxu0 %v192_v13 }
  0x12   :  { %171 = vmatpush3.bf16.msra.mxu0 %v79_v17 }
  0x92   :  { %v27_v18 = vpop.xlane.xlu0 %26  ;;  %v41_v22 = vpop.xlane.xlu1 %40 }
  0x93   :  { %v31_v19 = vmax.f32 %v27_v18, 1e-24 }
  0x95   :  { %183 = vrsqrt.f32 %v31_v19 }
  0x96   :  { %v30_v20 = vpop.xlane.xlu0 %29  ;;  %v44_v28 = vpop.xlane.xlu1 %43 }
  0x97   :  { %v32_v21 = vmax.f32 %v30_v20, 1e-24 }
  0x99   :  { %185 = vrsqrt.f32 %v32_v21 }
  0x9f   :  { %v184_v23 = vpop.eup %183 }
  0xa0   :  { %v35_v24 = vmul.f32 8.0, %v184_v23 }
  0xa2   :  { %v45_v25 = vmul.f32 %v41_v22, %v35_v24 }
  0xa3   :  { %v186_v26 = vpop.eup %185 }
  0xa4   :  { %v47_v29 = vmax.f32 %v45_v25, 1e-05  ;;  %v36_v30 = vmul.f32 8.0, %v186_v26 }
  0xa6   :  { %187 = vrcp.f32 %v47_v29  ;;  %v68_v31 = vmul.f32 %v67_v27, %v47_v29  ;;  %v46_v32 = vmul.f32 %v44_v28, %v36_v30 }
  0xa8   :  { %71 = vst.msk [vmem:[#allocation3] sm:$0xff] %vm70_vm2, %v68_v31  ;;  %v48_v33 = vmax.f32 %v46_v32, 1e-05 }
  0xaa   :  { %189 = vrcp.f32 %v48_v33  ;;  %v69_v34 = vmul.f32 %v67_v27, %v48_v33 }
  0xac   :  { %72 = vst.msk [vmem:[#allocation3 + $0x8] sm:$0xff] %vm70_vm2, %v69_v34 }
  0xaf   :  { %v125_v35 = vld [vmem:[#allocation3] sm:$0xff] }
  0xb0   :  { %v188_v36 = vpop.eup %187  ;;  %129 = vperm.xlu0 %181, %v125_v35  }
  0xb1   :  { %v50_v37 = vmul.f32 127.0, %v188_v36 }
  0xb3   :  { %v53_v38 = vmul.f32 %v50_v37, %v35_v24  ;;  %v126_v39 = vld [vmem:[#allocation3 + $0x8] sm:$0xff] }
  0xb4   :  { %v190_v40 = vpop.eup %189  ;;  %134 = vperm.xlu1 %182, %v126_v39  }
  0xb5   :  { %v55_v41 = vmul.f32 %v53_v38, %v217_v0  ;;  %v52_v42 = vmul.f32 127.0, %v190_v40 }
  0xb7   :  { %v176_v43 = vround.rtne.f32 %v55_v41  ;;  %v54_v44 = vmul.f32 %v52_v42, %v36_v30 }
  0xb9   :  { %v56_v45 = vmul.f32 %v54_v44, %v222_v1  ;;  %v59_v46 = vmax.f32 %v176_v43, -128.0 }
  0xbb   :  { %v177_v47 = vround.rtne.f32 %v56_v45  ;;  %v61_v49 = vmin.f32 %v59_v46, 127.0 }
  0xbd   :  { %v60_v48 = vmax.f32 %v177_v47, -128.0 }
  0xbf   :  { %v62_v50 = vmin.f32 %v60_v48, 127.0 }
  0xc1   :  { %v63_v51 = vpack.c.bf16 %v62_v50, %v61_v49 }
  0xc3   :  { %64 = vst.msk [vmem:[#allocation2] sm:$0xff] %vm24_vm0, %v63_v51 }
  0xca   :  { %v73_v52 = vld [vmem:[#allocation2] sm:$0xff] }
  0xcb   :  { %173 = vmatmul.mubr.msk.bf16.vlgmr.msra.gmra.mrb[0].mxu0 %vm24_vm0, %v73_v52 }
 0x12f   :  { %v130_v53 = vpop.permute.xlu0 %129 }
 0x133   :  { %v135_v57 = vpop.permute.xlu1 %134 }
 0x19e   :  { %v118_v54 = vpop.f32.mrb[0].mxu0 }
 0x19f   :  { %v137_v55 = vmul.f32 %v130_v53, %v118_v54  ;;  %v174_v56 = vpop.f32.mrb[1].mxu0 }
 0x1a0   :  { %v121_v58 = vpop.f32.mrb[2].mxu0 }
 0x1a1   :  { %v157_v59 = vpack.c.bf16 %v137_v55, %v137_v55  ;;  %v138_v60 = vmul.f32 %v135_v57, %v121_v58  ;;  %v175_v61 = vpop.f32.mrb[3].mxu0 }
 0x1a3   :  { %148 = vst.msk [vmem:[%s256_s3] sm:$0xf] %vm147_vm3, %v157_v59  ;;  %v158_v62 = vpack.c.bf16 %v138_v60, %v138_v60 }
 0x1a5   :  { %149 = vst.msk [vmem:[%s256_s3 + $0x4] sm:$0xf] %vm147_vm3, %v158_v62 }

// kernel: bit_mgqa_forward.8
= control target key start
LH: loop header
LB: loop body
LE: loop exit
PB: predicated region body
PF: predicated region fallthrough
CT: control target
= control target key end

     0   :  { %s998_s12 = smov 0   ;;  %s1000_s13 = smov 0   ;;  %s1103_s0 = inlined_call_operand.vmem [shape: bf16[2,8,64], index: 0, kind: input, shape index: {}]   ;;  %s1104_s1 = inlined_call_operand.vmem [shape: bf16[2,8,32], index: 1, kind: input, shape index: {}]   ;;  %s1105_s2 = inlined_call_operand.vmem [shape: bf16[2,8,32], index: 2, kind: input, shape index: {}]   ;;  %s1106_s3 = inlined_call_operand.vmem [shape: bf16[2,8,32], index: 3, kind: output, shape index: {}]  }
   0x1   :  { %s1002_s14 = smov 0  }
   0x2 LB: > { %s25_s15 = sadd.s32 1, %s962_s13  ;;  %p811_p0 = scmp.ge.s32.totalorder %s966_s14, 1  ;;  %s966_s14 = sphi %s1002_s14, %s13_s14   ;;  %s962_s13 = sphi %s1000_s13, %s1108_s13   ;;  %s958_s12 = sphi %s998_s12, %s1107_s12  }
   0x3   : > { %p27_p1 = scmp.ge.s32.totalorder %s25_s15, 2  ;;  %p173_p2 = scmp.lt.s32.totalorder %s966_s14, 3 }
   0x5   : > { %s1110_s15 = smov (%p27_p1, %s25_s15), 0  ;;  %p174_p3 = pnand %p811_p0, %p173_p2 }
   0x6   : > { %p209_p4 = scmp.lt.s32.totalorder (!%p174_p3), %s958_s12, 1  ;;  %v968_v0 = vmov (!%p174_p3), 0.0   ;;  %vm969_vm0 = vmmov (!%p174_p3), 0   ;;  %vm242_vm1 = vcmask (!%p174_p3), 64512   ;;  %s970_s23 = smov (!%p174_p3), 120   ;;  %vm305_vm2 = vcmask (!%p174_p3), 1043456  }
   0x7   : > { %177 = sbr.rel (%p174_p3) target bundleno = 1554 (0x612), region = 32  ;;  %844 = vmatprep.subr.bf16.mxu0 (!%p174_p3), %v968_v0  ;;  %846 = vmatprep.mubr.msk.bf16.mxu0 (!%p174_p3), %vm969_vm0, %v968_v0  ;;  %s971_s24 = smov (!%p174_p3), 80   ;;  %vm702_vm3 = vcmask (!%p174_p3), 130048   ;;  %vm704_vm4 = vcmask (!%p174_p3), 195584   ;;  %vm707_vm5 = vcmask (!%p174_p3), 257024  }
   0x8   : > { %850 = vmatprep.subr.bf16.mxu1 (!%p174_p3), %v968_v0  ;;  %852 = vmatprep.mubr.msk.bf16.mxu1 (!%p174_p3), %vm969_vm0, %v968_v0  ;;  %s972_s25 = smov (!%p174_p3), 112   ;;  %s973_s29 = smov (!%p174_p3), 96  }
   0x9   : > { %s974_s30 = smov (!%p174_p3), 104   ;;  %s975_s4 = smov (!%p174_p3), 8  }
   0xa   : > { %s976_s5 = smov (!%p174_p3), 16   ;;  %s977_s6 = smov (!%p174_p3), 24  }
   0xe   : > { %s1112_s12 = smov (!%p209_p4, %s958_s12), 1 }
   0xf   : > { %s1022_s16 = sshll.u32 %s1112_s12, 2 }
  0x10   : > { %s215_s19 = scalar_lea.vmem %s1103_s0, %s1022_s16  ;;  %s219_s22 = scalar_lea.vmem %s1104_s1, %s1022_s16 }
  0x11   : > { %v232_v1 = vld [vmem:[%s215_s19] sm:$0xf]  ;;  %s223_s28 = scalar_lea.vmem %s1105_s2, %s1022_s16  ;;  %s230_s9 = scalar_lea.vmem %s1106_s3, %s1022_s16 }
  0x12   : > { %v234_v2 = vld [vmem:[%s219_s22] sm:$0xf]  ;;  %v233_v3 = vunpack.c.l.bf16 %v232_v1 }
  0x13   : > { %v247_v4 = vsel %vm242_vm1, %v234_v2, 0  ;;  %v818_v5 = vcombine.low %v234_v2, %v234_v2  ;;  %v235_v20 = vld [vmem:[%s223_s28] sm:$0xf] }
  0x14   : > { %845 = vmatpush3.bf16.xpose.msra.mxu0 %v247_v4  ;;  %237 = vrot.lane.b32.xlu0 %v233_v3, %s970_s23  ;;  %v307_v21 = vsel %vm305_vm2, %v235_v20, 0  ;;  %v820_v57 = vcombine.low %v235_v20, %v235_v20 }
  0x15   : > { %355 = vrot.lane.b32.xlu1 %v818_v5, %s970_s23  ;;  %862 = vmatprep.subr.bf16.mxu0 %v968_v0 }
  0x16   : > { %851 = vmatpush3.bf16.msra.mxu1 %v307_v21 }
  0x17   : > { %856 = vmatprep.subr.bf16.mxu1 %v968_v0 }
  0x86   : > { %v238_v6 = vpop.permute.xlu0 %237 }
  0x87   : > { %v240_v7 = vadd.f32 %v238_v6, %v233_v3  ;;  %v356_v22 = vpop.permute.xlu1 %355 }
  0x88   : > { %v361_v28 = vsel %vm242_vm1, %v356_v22, 0 }
  0x89   : > { %v241_v8 = vpack.c.bf16 %v240_v7, %v240_v7 }
  0x8b   : > { %847 = vmatmul.mubr.msk.bf16.vlgmr.msra.gmra.mrb[0].mxu0 %vm242_vm1, %v241_v8 }
  0x8c   : > { %864 = vmatprep.mubr.msk.bf16.mxu0 %vm969_vm0, %v968_v0 }
 0x15e   : > { %v283_v9 = vpop.f32.mrb[0].mxu0 }
 0x15f   : > { %v289_v10 = vmul.f32 0.125, %v283_v9  ;;  %v848_v11 = vpop.f32.mrb[1].mxu0 }
 0x160   : > { %v286_v12 = vpop.f32.mrb[2].mxu0 }
 0x161   : > { %v849_v13 = vpop.f32.mrb[3].mxu0  ;;  %v290_v14 = vsel %vm242_vm1, %v289_v10, -inf }
 0x162   : > { %291 = vmax.xlane.f32.xlu0 %v290_v14 }
 0x178   : > { %578 = vrot.lane.b32.xlu0 %v241_v8, %s971_s24 }
 0x1ef   : > { %v292_v15 = vpop.xlane.xlu0 %291 }
 0x1f0   : > { %v293_v16 = vsub.f32 %v289_v10, %v292_v15 }
 0x1f2   : > { %v294_v17 = vmul.f32 1.442695, %v293_v16 }
 0x1f3   : > { %v579_v34 = vpop.permute.xlu0 %578 }
 0x1f4   : > { %928 = vpow2.f32 %v294_v17 }
 0x1fe   : > { %v929_v18 = vpop.eup %928 }
 0x1ff   : > { %v296_v19 = vsel %vm242_vm1, %v929_v18, 0.0 }
 0x200   : > { %297 = vadd.xlane.f32.xlu1 %v296_v19 }
 0x211   : > { %350 = vrot.lane.b32.xlu1 %v241_v8, %s972_s25 }
 0x215   : > { %469 = vrot.lane.b32.xlu1 %v818_v5, %s972_s25 }
 0x219   : > { %467 = vrot.lane.b32.xlu1 %v241_v8, %s973_s29 }
 0x21d   : > { %580 = vrot.lane.b32.xlu1 %v818_v5, %s974_s30 }
 0x28d   : > { %v298_v23 = vpop.xlane.xlu1 %297 }
 0x28e   : > { %930 = vrcp.f32 %v298_v23 }
 0x291   : > { %v351_v25 = vpop.permute.xlu1 %350 }
 0x295   : > { %v470_v29 = vpop.permute.xlu1 %469 }
 0x296   : > { %v475_v30 = vsel %vm242_vm1, %v470_v29, 0 }
 0x298   : > { %v931_v24 = vpop.eup %930 }
 0x299   : > { %v300_v26 = vmul.f32 %v931_v24, %v929_v18  ;;  %v468_v31 = vpop.permute.xlu1 %467 }
 0x29b   : > { %v301_v27 = vpack.c.bf16 %v300_v26, %v300_v26 }
 0x29d   : > { %853 = vmatmul.mubr.msk.bf16.vlgmr.msra.gmra.mrb[0].mxu1 %vm242_vm1, %v301_v27  ;;  %v581_v32 = vpop.permute.xlu1 %580 }
 0x29e   : > { %857 = vmatpush3.bf16.xpose.msra.mxu1 %v361_v28  ;;  %858 = vmatprep.mubr.msk.bf16.mxu1 %vm969_vm0, %v968_v0  ;;  %v586_v33 = vsel %vm242_vm1, %v581_v32, 0 }
 0x29f   : > { %868 = vmatprep.subr.bf16.mxu1 %v968_v0 }
 0x2a5   : > { %859 = vmatmul.mubr.msk.bf16.vlgmr.msra.gmra.mrb[4].mxu1 %vm242_vm1, %v351_v25 }
 0x2a6   : > { %869 = vmatpush3.bf16.xpose.msra.mxu1 %v475_v30  ;;  %870 = vmatprep.mubr.msk.bf16.mxu1 %vm969_vm0, %v968_v0 }
 0x2a7   : > { %880 = vmatprep.subr.bf16.mxu1 %v968_v0 }
 0x2ad   : > { %871 = vmatmul.mubr.msk.bf16.vlgmr.msra.gmra.mrb[8].mxu1 %vm242_vm1, %v468_v31 }
 0x2ae   : > { %881 = vmatpush3.bf16.xpose.msra.mxu1 %v586_v33  ;;  %882 = vmatprep.mubr.msk.bf16.mxu1 %vm969_vm0, %v968_v0 }
 0x2b5   : > { %883 = vmatmul.mubr.msk.bf16.vlgmr.msra.gmra.mrb[12].mxu1 %vm242_vm1, %v579_v34 }
 0x370   : > { %v1065_v35 = vpop.f32.mrb[0].mxu1 }
 0x371   : > { %v854_v36 = vpop.f32.mrb[1].mxu1 }
 0x372   : > { %v346_v37 = vpop.f32.mrb[2].mxu1 }
 0x373   : > { %v855_v38 = vpop.f32.mrb[3].mxu1 }
 0x378   : > { %v397_v39 = vpop.f32.mrb[4].mxu1 }
 0x379   : > { %v403_v40 = vmul.f32 0.125, %v397_v39  ;;  %v860_v41 = vpop.f32.mrb[5].mxu1 }
 0x37a   : > { %v400_v42 = vpop.f32.mrb[6].mxu1 }
 0x37b   : > { %v861_v43 = vpop.f32.mrb[7].mxu1  ;;  %v404_v44 = vsel %vm242_vm1, %v403_v40, -inf }
 0x37c   : > { %405 = vmax.xlane.f32.xlu1 %v404_v44 }
 0x380   : > { %v511_v45 = vpop.f32.mrb[8].mxu1 }
 0x381   : > { %v517_v46 = vmul.f32 0.125, %v511_v45  ;;  %v872_v47 = vpop.f32.mrb[9].mxu1 }
 0x382   : > { %v514_v48 = vpop.f32.mrb[10].mxu1 }
 0x383   : > { %v873_v49 = vpop.f32.mrb[11].mxu1  ;;  %v518_v50 = vsel %vm242_vm1, %v517_v46, -inf }
 0x384   : > { %519 = vmax.xlane.f32.xlu0 %v518_v50 }
 0x388   : > { %v622_v51 = vpop.f32.mrb[12].mxu1 }
 0x389   : > { %v628_v52 = vmul.f32 0.125, %v622_v51  ;;  %v884_v53 = vpop.f32.mrb[13].mxu1 }
 0x38a   : > { %v625_v54 = vpop.f32.mrb[14].mxu1 }
 0x38b   : > { %v885_v55 = vpop.f32.mrb[15].mxu1  ;;  %v629_v56 = vsel %vm242_vm1, %v628_v52, -inf }
 0x38c   : > { %630 = vmax.xlane.f32.xlu1 %v629_v56 }
 0x39a   : > { %419 = vrot.lane.b32.xlu0 %v820_v57, %s970_s23 }
 0x39d   : > { %530 = vrot.lane.b32.xlu1 %v820_v57, %s972_s25 }
 0x409   : > { %v406_v58 = vpop.xlane.xlu1 %405 }
 0x40a   : > { %v407_v59 = vsub.f32 %v403_v40, %v406_v58 }
 0x40c   : > { %v408_v60 = vmul.f32 1.442695, %v407_v59 }
 0x40e   : > { %932 = vpow2.f32 %v408_v60 }
 0x411   : > { %v520_v61 = vpop.xlane.xlu0 %519 }
 0x412   : > { %v521_v62 = vsub.f32 %v517_v46, %v520_v61 }
 0x414   : > { %v522_v63 = vmul.f32 1.442695, %v521_v62 }
 0x415   : > { %v420_v10 = vpop.permute.xlu0 %419 }
 0x416   : > { %934 = vpow2.f32 %v522_v63  ;;  %v425_v11 = vsel %vm305_vm2, %v420_v10, 0 }
 0x417   : > { %863 = vmatpush3.bf16.msra.mxu0 %v425_v11 }
 0x418   : > { %v933_v1 = vpop.eup %932  ;;  %874 = vmatprep.subr.bf16.mxu0 %v968_v0 }
 0x419   : > { %v631_v2 = vpop.xlane.xlu1 %630  ;;  %v410_v3 = vsel %vm242_vm1, %v933_v1, 0.0 }
 0x41a   : > { %v632_v4 = vsub.f32 %v628_v52, %v631_v2  ;;  %411 = vadd.xlane.f32.xlu1 %v410_v3 }
 0x41c   : > { %v633_v5 = vmul.f32 1.442695, %v632_v4 }
 0x41d   : > { %v531_v12 = vpop.permute.xlu1 %530 }
 0x41e   : > { %936 = vpow2.f32 %v633_v5  ;;  %v536_v18 = vsel %vm305_vm2, %v531_v12, 0 }
 0x420   : > { %v935_v6 = vpop.eup %934 }
 0x421   : > { %v524_v7 = vsel %vm242_vm1, %v935_v6, 0.0 }
 0x422   : > { %525 = vadd.xlane.f32.xlu1 %v524_v7 }
 0x428   : > { %v937_v8 = vpop.eup %936 }
 0x429   : > { %v635_v9 = vsel %vm242_vm1, %v937_v8, 0.0 }
 0x42a   : > { %636 = vadd.xlane.f32.xlu1 %v635_v9 }
 0x43b   : > { %641 = vrot.lane.b32.xlu1 %v820_v57, %s974_s30 }
 0x4a7   : > { %v412_v13 = vpop.xlane.xlu1 %411 }
 0x4a8   : > { %938 = vrcp.f32 %v412_v13 }
 0x4af   : > { %v526_v14 = vpop.xlane.xlu1 %525 }
 0x4b0   : > { %940 = vrcp.f32 %v526_v14 }
 0x4b2   : > { %v939_v15 = vpop.eup %938 }
 0x4b3   : > { %v414_v16 = vmul.f32 %v939_v15, %v933_v1 }
 0x4b5   : > { %v415_v17 = vpack.c.bf16 %v414_v16, %v414_v16 }
 0x4b7   : > { %v637_v19 = vpop.xlane.xlu1 %636  ;;  %865 = vmatmul.mubr.msk.bf16.vlgmr.msra.gmra.mrb[4].mxu0 %vm242_vm1, %v415_v17 }
 0x4b8   : > { %942 = vrcp.f32 %v637_v19  ;;  %875 = vmatpush3.bf16.msra.mxu0 %v536_v18  ;;  %876 = vmatprep.mubr.msk.bf16.mxu0 %vm969_vm0, %v968_v0 }
 0x4b9   : > { %886 = vmatprep.subr.bf16.mxu0 %v968_v0 }
 0x4ba   : > { %v941_v20 = vpop.eup %940 }
 0x4bb   : > { %v528_v21 = vmul.f32 %v941_v20, %v935_v6  ;;  %v642_v22 = vpop.permute.xlu1 %641 }
 0x4bc   : > { %v647_v23 = vsel %vm305_vm2, %v642_v22, 0 }
 0x4bd   : > { %v529_v24 = vpack.c.bf16 %v528_v21, %v528_v21 }
 0x4bf   : > { %877 = vmatmul.mubr.msk.bf16.vlgmr.msra.gmra.mrb[8].mxu0 %vm242_vm1, %v529_v24 }
 0x4c0   : > { %887 = vmatpush3.bf16.msra.mxu0 %v647_v23  ;;  %888 = vmatprep.mubr.msk.bf16.mxu0 %vm969_vm0, %v968_v0 }
 0x4c2   : > { %v943_v25 = vpop.eup %942 }
 0x4c3   : > { %v639_v26 = vmul.f32 %v943_v25, %v937_v8 }
 0x4c5   : > { %v640_v27 = vpack.c.bf16 %v639_v26, %v639_v26 }
 0x4c7   : > { %889 = vmatmul.mubr.msk.bf16.vlgmr.msra.gmra.mrb[12].mxu0 %vm242_vm1, %v640_v27 }
 0x58a   : > { %v461_v28 = vpop.f32.mrb[4].mxu0 }
 0x58b   : > { %690 = vrot.lane.b32.xlu0 %v461_v28, %s975_s4  ;;  %v866_v29 = vpop.f32.mrb[5].mxu0 }
 0x58c   : > { %v464_v30 = vpop.f32.mrb[6].mxu0 }
 0x58d   : > { %v867_v31 = vpop.f32.mrb[7].mxu0 }
 0x592   : > { %v572_v32 = vpop.f32.mrb[8].mxu0 }
 0x593   : > { %694 = vrot.lane.b32.xlu1 %v572_v32, %s976_s5  ;;  %v878_v33 = vpop.f32.mrb[9].mxu0 }
 0x594   : > { %v575_v34 = vpop.f32.mrb[10].mxu0 }
 0x595   : > { %v879_v36 = vpop.f32.mrb[11].mxu0 }
 0x59a   : > { %v683_v37 = vpop.f32.mrb[12].mxu0 }
 0x59b   : > { %698 = vrot.lane.b32.xlu0 %v683_v37, %s977_s6  ;;  %v890_v0 = vpop.f32.mrb[13].mxu0 }
 0x59c   : > { %v686_v38 = vpop.f32.mrb[14].mxu0 }
 0x59d   : > { %v891_v39 = vpop.f32.mrb[15].mxu0 }
 0x5fd   : > { %v691_v40 = vpop.permute.xlu0 %690 }
 0x5fe   : > { %v701_v42 = vsel %vm242_vm1, %v1065_v35, %v691_v40 }
 0x605   : > { %v695_v41 = vpop.permute.xlu1 %694 }
 0x606   : > { %v703_v43 = vsel %vm702_vm3, %v701_v42, %v695_v41 }
 0x60d   : > { %v699_v44 = vpop.permute.xlu0 %698 }
 0x60e   : > { %v705_v45 = vsel %vm704_vm4, %v703_v43, %v699_v44 }
 0x60f   : > { %v706_v46 = vpack.c.bf16 %v705_v45, %v705_v45 }
 0x611   : > { %708 = vst.msk [vmem:[%s230_s9] sm:$0xf] %vm707_vm5, %v706_v46 }
 0x612 PF: > { %s13_s14 = sadd.s32 1, %s966_s14   ;;  %s1107_s12 = smov %s962_s13 }
 0x613   : > { %p10_p5 = scmp.ge.s32.totalorder %s13_s14, 4   ;;  %s1108_s13 = smov %s1110_s15 }
 0x615   :  { %12 = sbr.rel (!%p10_p5) target bundleno = 2 (0x2), region = 68 }

// kernel: bit_mgqa_forward.9
= control target key start
LH: loop header
LB: loop body
LE: loop exit
PB: predicated region body
PF: predicated region fallthrough
CT: control target
= control target key end

     0   :  { %vm31_vm0 = vcmask 261120   ;;  %s346_s0 = inlined_call_operand.vmem [shape: bf16[16,32], index: 0, kind: input, shape index: {}]   ;;  %s347_s1 = inlined_call_operand.vmem [shape: f32[1,32], index: 1, kind: input, shape index: {}]   ;;  %s348_s2 = inlined_call_operand.vmem [shape: f32[1,32], index: 2, kind: input, shape index: {}]   ;;  %s349_s3 = inlined_call_operand.vmem [shape: s8[32,64], index: 3, kind: input, shape index: {}]   ;;  %s350_s4 = inlined_call_operand.<no memory space> [shape: f32[1], index: 4, kind: input, shape index: {}]   ;;  %s351_s5 = inlined_call_operand.hbm [shape: f32[16,64], index: 5, kind: output, shape index: {}]  }
   0x1   :  { %v213_v0 = vld [vmem:[%s346_s0] sm:$0xff]  }
   0x2   :  { %11 = vsyncpa [#allocation6], 0  ;;  %v214_v1 = vunpack.c.l.bf16 %v213_v0  ;;  %v215_v2 = vunpack.c.h.bf16 %v213_v0  ;;  %v209_v22 = vld [vmem:[%s347_s1] ss:$0 sm:$0xff]  ;;  %v273_v39 = vmov 0   ;;  %v274_v42 = vmov 0.0  }
   0x3   :  { %v210_v24 = vld [vmem:[%s348_s2] ss:$0 sm:$0xff]  ;;  %235 = vset.pattern.permute.xlu0 %v273_v39  ;;  %236 = vset.pattern.permute.xlu1 %v273_v39  ;;  %vm275_vm1 = vmmov 0   ;;  %vm124_vm2 = vcmask 7168   ;;  %vm190_vm3 = vcmask 523264  }
   0x4   :  { %v32_v3 = vsel %vm31_vm0, %v214_v1, 0.0  ;;  %v35_v4 = vsel %vm31_vm0, %v215_v2, 0.0  ;;  %v128_v40 = vld [vmem:[%s349_s3] sm:$0xff]  ;;  %219 = vmatprep.subr.bf16.mxu0 %v274_v42  ;;  %223 = vmatprep.mubr.msk.bf16.mxu0 %vm275_vm1, %v274_v42  ;;  %s120_s3 = smul.f32 0.007874016, %s350_s4  ;;  %s276_s4 = smov [#allocation5]  }
   0x5   :  { %33 = vadd.xlane.f32.xlu0 %v32_v3  ;;  %v129_v41 = vunpack.c.l.s8.bf16 %v128_v40  ;;  %v130_v43 = vunpack.c.h.s8.bf16 %v128_v40  ;;  %s198_s25 = sshll.u32 %s276_s4, 4  ;;  %s199_s25 = int_to_ptr.vmem [resolvable:$true] %s198_s25 }
   0x6   :  { %v121_v53 = vstv %s120_s3  ;;  %s249_s26 = scalar_lea.vmem %s199_s25, 256  ;;  %p254_p1 = scmp.lt.s32.totalorder %s199_s25, %s199_s25 }
   0x7   :  { %220 = vmatpush3.bf16.msra.mxu0 %v129_v41  ;;  %p250_p0 = scmp.ne.s32.totalorder %s199_s25, %s249_s26  ;;  %p255_p2 = scmp.lt.s32.totalorder %s249_s26, %s249_s26 }
   0x8   :  { %221 = vmatprep.subr.bf16.mxu0 %v274_v42 }
   0x9   :  { %36 = vadd.xlane.f32.xlu0 %v35_v4  ;;  %p256_p3 = por %p255_p2, %p254_p1 }
   0xb   :  { %222 = vmatpush3.bf16.msra.mxu0 %v130_v43  ;;  %p257_p4 = pnand %p256_p3, %p250_p0 }
  0x92   :  { %v34_v5 = vpop.xlane.xlu0 %33 }
  0x93   :  { %v39_v6 = vmul.f32 0.03125, %v34_v5 }
  0x95   :  { %v41_v7 = vsub.f32 %v214_v1, %v39_v6 }
  0x96   :  { %v37_v8 = vpop.xlane.xlu0 %36 }
  0x97   :  { %v40_v9 = vmul.f32 0.03125, %v37_v8  ;;  %v43_v10 = vmul.f32 %v41_v7, %v41_v7 }
  0x99   :  { %v42_v11 = vsub.f32 %v215_v2, %v40_v9  ;;  %v45_v12 = vsel %vm31_vm0, %v43_v10, 0.0 }
  0x9a   :  { %46 = vadd.xlane.f32.xlu1 %v45_v12 }
  0x9b   :  { %v44_v13 = vmul.f32 %v42_v11, %v42_v11 }
  0x9d   :  { %v48_v14 = vsel %vm31_vm0, %v44_v13, 0.0 }
  0x9e   :  { %49 = vadd.xlane.f32.xlu1 %v48_v14 }
 0x127   :  { %v47_v15 = vpop.xlane.xlu1 %46 }
 0x128   :  { %v51_v16 = vmul.f32 0.03125, %v47_v15 }
 0x12a   :  { %v53_v17 = vadd.f32 1e-05, %v51_v16 }
 0x12b   :  { %v50_v18 = vpop.xlane.xlu1 %49 }
 0x12c   :  { %237 = vrsqrt.f32 %v53_v17  ;;  %v52_v19 = vmul.f32 0.03125, %v50_v18 }
 0x12e   :  { %v54_v20 = vadd.f32 1e-05, %v52_v19 }
 0x130   :  { %239 = vrsqrt.f32 %v54_v20 }
 0x136   :  { %v238_v21 = vpop.eup %237 }
 0x137   :  { %v57_v23 = vmul.f32 %v238_v21, %v41_v7 }
 0x139   :  { %v66_v25 = vmul.f32 %v209_v22, %v57_v23 }
 0x13a   :  { %v240_v26 = vpop.eup %239 }
 0x13b   :  { %v75_v27 = vadd.f32 %v210_v24, %v66_v25  ;;  %v58_v28 = vmul.f32 %v240_v26, %v42_v11 }
 0x13d   :  { %v77_v29 = vmul.f32 %v75_v27, %v75_v27  ;;  %v67_v30 = vmul.f32 %v209_v22, %v58_v28  ;;  %v91_v32 = vand.u32 2147483647, %v75_v27 }
 0x13f   :  { %v79_v31 = vsel %vm31_vm0, %v77_v29, 0.0  ;;  %v76_v33 = vadd.f32 %v210_v24, %v67_v30  ;;  %v93_v35 = vsel %vm31_vm0, %v91_v32, -inf }
 0x140   :  { %80 = vadd.xlane.f32.xlu0 %v79_v31 }
 0x141   :  { %v78_v34 = vmul.f32 %v76_v33, %v76_v33  ;;  %v92_v37 = vand.u32 2147483647, %v76_v33 }
 0x143   :  { %v82_v36 = vsel %vm31_vm0, %v78_v34, 0.0  ;;  %v96_v38 = vsel %vm31_vm0, %v92_v37, -inf }
 0x144   :  { %94 = vmax.xlane.f32.xlu0 %v93_v35  ;;  %83 = vadd.xlane.f32.xlu1 %v82_v36 }
 0x148   :  { %97 = vmax.xlane.f32.xlu1 %v96_v38 }
 0x1cd   :  { %v81_v44 = vpop.xlane.xlu0 %80 }
 0x1ce   :  { %v85_v45 = vmax.f32 %v81_v44, 1e-24 }
 0x1d0   :  { %241 = vrsqrt.f32 %v85_v45 }
 0x1d1   :  { %v84_v46 = vpop.xlane.xlu1 %83  ;;  %v95_v50 = vpop.xlane.xlu0 %94 }
 0x1d2   :  { %v86_v47 = vmax.f32 %v84_v46, 1e-24 }
 0x1d4   :  { %243 = vrsqrt.f32 %v86_v47 }
 0x1d5   :  { %v98_v56 = vpop.xlane.xlu1 %97 }
 0x1da   :  { %v242_v48 = vpop.eup %241 }
 0x1db   :  { %v89_v49 = vmul.f32 5.656854, %v242_v48 }
 0x1dd   :  { %v99_v51 = vmul.f32 %v95_v50, %v89_v49 }
 0x1de   :  { %v244_v52 = vpop.eup %243 }
 0x1df   :  { %v101_v54 = vmax.f32 %v99_v51, 1e-05  ;;  %v90_v55 = vmul.f32 5.656854, %v244_v52 }
 0x1e1   :  { %245 = vrcp.f32 %v101_v54  ;;  %v122_v57 = vmul.f32 %v121_v53, %v101_v54  ;;  %v100_v58 = vmul.f32 %v98_v56, %v90_v55 }
 0x1e3   :  { %125 = vst.msk [vmem:[#allocation3] sm:$0xff] %vm124_vm2, %v122_v57  ;;  %v102_v59 = vmax.f32 %v100_v58, 1e-05 }
 0x1e5   :  { %247 = vrcp.f32 %v102_v59  ;;  %v123_v60 = vmul.f32 %v121_v53, %v102_v59 }
 0x1e7   :  { %126 = vst.msk [vmem:[#allocation3 + $0x8] sm:$0xff] %vm124_vm2, %v123_v60 }
 0x1ea   :  { %v176_v61 = vld [vmem:[#allocation3] sm:$0xff] }
 0x1eb   :  { %v246_v62 = vpop.eup %245  ;;  %180 = vperm.xlu0 %235, %v176_v61  }
 0x1ec   :  { %v104_v63 = vmul.f32 127.0, %v246_v62 }
 0x1ee   :  { %v107_v0 = vmul.f32 %v104_v63, %v89_v49  ;;  %v177_v1 = vld [vmem:[#allocation3 + $0x8] sm:$0xff] }
 0x1ef   :  { %v248_v2 = vpop.eup %247  ;;  %185 = vperm.xlu1 %236, %v177_v1  }
 0x1f0   :  { %v109_v3 = vmul.f32 %v107_v0, %v75_v27  ;;  %v106_v4 = vmul.f32 127.0, %v248_v2 }
 0x1f2   :  { %v227_v5 = vround.rtne.f32 %v109_v3  ;;  %v108_v6 = vmul.f32 %v106_v4, %v90_v55 }
 0x1f4   :  { %v110_v7 = vmul.f32 %v108_v6, %v76_v33  ;;  %v113_v8 = vmax.f32 %v227_v5, -128.0 }
 0x1f6   :  { %v228_v9 = vround.rtne.f32 %v110_v7  ;;  %v115_v11 = vmin.f32 %v113_v8, 127.0 }
 0x1f8   :  { %v114_v10 = vmax.f32 %v228_v9, -128.0 }
 0x1fa   :  { %v116_v12 = vmin.f32 %v114_v10, 127.0 }
 0x1fc   :  { %v117_v13 = vpack.c.bf16 %v116_v12, %v115_v11 }
 0x1fe   :  { %118 = vst.msk [vmem:[#allocation2] sm:$0xff] %vm31_vm0, %v117_v13 }
 0x205   :  { %v127_v14 = vld [vmem:[#allocation2] sm:$0xff] }
 0x206   :  { %224 = vmatmul.mubr.msk.bf16.vlgmr.msra.gmra.mrb[0].mxu0 %vm31_vm0, %v127_v14 }
 0x26a   :  { %v181_v15 = vpop.permute.xlu0 %180 }
 0x26e   :  { %v186_v19 = vpop.permute.xlu1 %185 }
 0x2d9   :  { %v169_v16 = vpop.f32.mrb[0].mxu0 }
 0x2da   :  { %v188_v17 = vmul.f32 %v181_v15, %v169_v16  ;;  %v225_v18 = vpop.f32.mrb[1].mxu0 }
 0x2db   :  { %v172_v20 = vpop.f32.mrb[2].mxu0 }
 0x2dc   :  { %191 = vst.msk [vmem:[#allocation5] sm:$0xff] %vm190_vm3, %v188_v17  ;;  %v189_v21 = vmul.f32 %v186_v19, %v172_v20  ;;  %v226_v22 = vpop.f32.mrb[3].mxu0 }
 0x2de   :  { %192 = vst.msk [vmem:[#allocation5 + $0x8] sm:$0xff] %vm190_vm3, %v189_v21 }
 0x2df   :  { %260 = shalt.err (!%p257_p4)
}
 0x2e0   :  { %s261_s29 = scalar_lea.hbm %s351_s5, 256 }
 0x2e1   :  { %p262_p5 = scmp.ne.s32.totalorder %s351_s5, %s261_s29  ;;  %p265_p6 = scmp.lt.u32.totalorder %s261_s29, %s351_s5 }
 0x2e3   :  { %p267_p7 = pnand %p265_p6, %p262_p5 }
 0x2e5   :  { %270 = shalt.err (!%p267_p7)
}
 0x2e6   :  { %s277_s9 = smov 128   ;;  %s278_s10 = smov 8  }
 0x2e7   :  { %204 = dma.vmem_to_hbm [thread:$0]  %s199_s25, 256, %s351_s5, [#allocation6], %s277_s9, %s277_s9, %s278_s10  }
 0x2e8   :  { %271 = dma.done.wait [#allocation6], 256  }
 0x2e9   :  { %272 = vsyncadd [#allocation6], 4294967040 }
 0x2ea   :  { %208 = vsyncpa [#allocation6], 1 }

</bundles_post_ra>
